<compile_context>
chip_gen: v7x
topology: tpu7x:2x2x1
jax: 0.10.0
libtpu: 0.0.40
codegen_flags: <defaults>
</compile_context>

<pallas_src>
import jax
import jax.numpy as jnp
import numpy as np
from jax import lax
from jax.experimental import pallas as pl
from jax.experimental.pallas import tpu as pltpu


# ----------------------------- VMEM-budgeted chunking ------------------------

_VMEM_BLOCK_BUDGET = 40 * 1024 * 1024   # bytes of pipelined blocks we allow
_VMEM_LIMIT_BYTES = 48 * 1024 * 1024    # raised scoped-VMEM limit (<= 64 MiB v7x phys)


def _pick_chunk(T, B, H, gx_bytes, out_bytes, budget_bytes):
    """Largest time-chunk Tc (divisor of T) fitting the per-grid-step VMEM budget.

    Per grid step (one direction at a time, BlockSpec double-buffers each block):
      gx in   : 2 * Tc*B*4H * gx_bytes
      out     : 2 * Tc*B*H  * out_bytes
      W_hh    : 2 * H*4H    * gx_bytes   (resident RHS)
      hT/cT   : 2 * 2*B*H   * out_bytes
      carries : 2 * B*H * 4
    """
    G = 4 * H
    fixed = 2 * H * G * gx_bytes + 2 * 2 * B * H * out_bytes + 2 * B * H * 4
    per_tc = 2 * B * G * gx_bytes + 2 * B * H * out_bytes
    tc_max = max(1, (max(budget_bytes - fixed, per_tc)) // per_tc)
    for c in range(int(min(T, tc_max)), 0, -1):
        if T % c == 0:
            return int(c)
    return 1


# ----------------------------- Pallas kernel --------------------------------

def _make_lstm_kernel(Tc, B, H, param_dtype, unroll):
    """One direction's chunk of the LSTM recurrence (direction = grid axis 0).

    Ref shapes (direction dim squeezed by the BlockSpec):
      gx_ref  (Tc, B, 4H) param_dtype   x-projection (+bias), precomputed
      whh_ref (H, 4H)     param_dtype   pre-transposed recurrent weights
      out_ref (Tc, B, H)  f32           hidden outputs for this chunk
      hT_ref, cT_ref (B, H) f32         final states (written on last chunk only)
      h_scr, c_scr  (B, H) f32          state carried across time chunks
    """

    def kernel(gx_ref, whh_ref, out_ref, hT_ref, cT_ref, h_scr, c_scr):
        d = pl.program_id(0)          # direction (0 = forward, 1 = backward)
        chunk = pl.program_id(1)      # time chunk (serial / "arbitrary")

        @pl.when(chunk == 0)
        def _():
            h_scr[...] = jnp.zeros_like(h_scr)
            c_scr[...] = jnp.zeros_like(c_scr)

        def step(s, carry):
            h, c = carry                                   # (B, H) f32 each
            # forward walks 0..Tc-1 inside its chunk; backward (d=1) walks Tc-1..0
            # inside its (index_map-reversed) chunk.
            s_idx = s + d * (Tc - 1 - 2 * s)
            # Recurrent matmul: bf16 (or f32) MXU operands, f32 accumulation.
            # NOTE: whh_ref is re-read here (not hoisted to a value outside the loop)
            # so the MXU streams it from VMEM instead of pinning 16 MiB of vregs at
            # production H.
            gates = (gx_ref[s_idx].astype(jnp.float32) +
                     jnp.dot(h.astype(param_dtype), whh_ref[...],
                             preferred_element_type=jnp.float32))
            # Gate slices are whole 128-lane tiles whenever H % 128 == 0 (production
            # sizes); f32 gate math is portable to v5e (no bf16 VPU/EUP there).
            i = jax.nn.sigmoid(gates[:, 0 * H:1 * H])
            f = jax.nn.sigmoid(gates[:, 1 * H:2 * H])
            g = jnp.tanh(gates[:, 2 * H:3 * H])
            o = jax.nn.sigmoid(gates[:, 3 * H:4 * H])

            c_new = f * c + i * g
            h_new = o * jnp.tanh(c_new)
            out_ref[s_idx] = h_new
            return h_new, c_new

        hF, cF = lax.fori_loop(0, Tc, step, (h_scr[...], c_scr[...]),
                               unroll=unroll)
        h_scr[...] = hF
        c_scr[...] = cF

        @pl.when(chunk == pl.num_programs(1) - 1)
        def _():
            hT_ref[...] = hF
            cT_ref[...] = cF

    return kernel


def _input_projection(x, w_ih_all, b_all, param_dtype):
    """Hoisted x-projection for all directions of one layer, bias folded in.

    x is either (T, B, D) (embeddings) or (P, T, B, Hp) — the previous layer's
    per-direction outputs; in the latter case the direction concat is fused into
    this matmul by reshaping the weight columns (no (T,B,2H) materialization).
    Returns (ndir, T, B, 4H) in param_dtype.
    """
    ndir, G, _Din = w_ih_all.shape
    w = w_ih_all.astype(param_dtype)
    if x.ndim == 3:
        gx = jnp.einsum('tbd,ngd->ntbg', x.astype(param_dtype), w,
                        preferred_element_type=jnp.float32)
    else:
        P, _T, _B, Hp = x.shape
        w4 = w.reshape(ndir, G, P, Hp)
        gx = jnp.einsum('ptbh,ngph->ntbg', x.astype(param_dtype), w4,
                        preferred_element_type=jnp.float32)
    gx = gx + b_all[:, None, None, :]
    return gx.astype(param_dtype)


def lstm_layer_pallas(x, dir_params, param_dtype=jnp.bfloat16,
                      vmem_block_budget=_VMEM_BLOCK_BUDGET,
                      vmem_limit_bytes=_VMEM_LIMIT_BYTES):
    """All directions of one LSTM layer in a single Pallas call.

    x          : (T, B, D) f32  or  (P, T, B, Hp) f32 (previous layer, per direction)
    dir_params : list over directions of (w_ih (4H, D), w_hh (4H, H), b (4H,)),
                 b = b_ih + b_hh, PyTorch gate order (i, f, g, o).
    Returns (out (ndir, T, B, H) f32, hT (ndir, B, H) f32, cT (ndir, B, H) f32).
    """
    ndir = len(dir_params)
    H = dir_params[0][1].shape[1]
    G = 4 * H
    T = x.shape[-3]
    B = x.shape[-2]

    w_ih_all = jnp.stack([p[0] for p in dir_params], axis=0)        # (ndir, 4H, D)
    b_all = jnp.stack([p[2] for p in dir_params], axis=0)           # (ndir, 4H)
    # Pre-transpose the recurrent weights once: (H, 4H) MXU-friendly RHS, bf16 stream.
    whh = jnp.stack([p[1].T for p in dir_params], axis=0).astype(param_dtype)

    # (1) Hoisted x-projection for the whole sequence (plain XLA, MXU-dense), bf16 out.
    gx = _input_projection(x, w_ih_all, b_all, param_dtype)         # (ndir, T, B, 4H)

    # (2) VMEM-budget-driven time chunking.
    gx_bytes = jnp.dtype(param_dtype).itemsize
    out_bytes = 4
    Tc = _pick_chunk(T, B, H, gx_bytes, out_bytes, vmem_block_budget)
    n_chunks = T // Tc
    unroll = min(Tc, 8)              # tuned partial unroll (LLO visibility, no vreg cliff)

    def gx_map(d, c):
        # backward direction reads time chunks in reverse order (no x[::-1] pass).
        return (d, c + d * (n_chunks - 1 - 2 * c), 0, 0)

    def whh_map(d, c):
        return (d, 0, 0)

    def out_map(d, c):
        return (d, c + d * (n_chunks - 1 - 2 * c), 0, 0)

    def st_map(d, c):
        return (d, 0, 0)

    gx_kwargs = {}
    if n_chunks >= 4:
        # deepen input prefetch when the per-chunk compute is short
        gx_kwargs = dict(pipeline_mode=pl.Buffered(3))

    in_specs = [pl.BlockSpec((None, Tc, B, G), gx_map, **gx_kwargs),
                pl.BlockSpec((None, H, G), whh_map)]
    out_specs = (pl.BlockSpec((None, Tc, B, H), out_map),
                 pl.BlockSpec((None, B, H), st_map),
                 pl.BlockSpec((None, B, H), st_map))
    out_shape = (jax.ShapeDtypeStruct((ndir, T, B, H), jnp.float32),
                 jax.ShapeDtypeStruct((ndir, B, H), jnp.float32),
                 jax.ShapeDtypeStruct((ndir, B, H), jnp.float32))

    cost = pl.CostEstimate(
        flops=2 * ndir * T * B * G * H,
        transcendentals=ndir * T * B * 5 * H,
        bytes_accessed=(gx.size * gx_bytes + ndir * T * B * H * 4
                        + ndir * H * G * gx_bytes + 4 * ndir * B * H * 4))

    grid_spec = pltpu.PrefetchScalarGridSpec(
        num_scalar_prefetch=0,
        grid=(ndir, n_chunks),
        in_specs=in_specs,
        out_specs=out_specs,
        scratch_shapes=[pltpu.VMEM((B, H), jnp.float32),     # h carry
                        pltpu.VMEM((B, H), jnp.float32)],    # c carry
    )

    out, hT, cT = pl.pallas_call(
        _make_lstm_kernel(Tc, B, H, param_dtype, unroll),
        out_shape=out_shape,
        grid_spec=grid_spec,
        compiler_params=pltpu.CompilerParams(
            # directions are independent (2x on v7x's two TCs); time is a recurrence.
            dimension_semantics=("parallel", "arbitrary"),
            vmem_limit_bytes=vmem_limit_bytes),
        cost_estimate=cost,
    )(gx, whh)
    return out, hT, cT


# --------------------------- pure-JAX reference ------------------------------

def lstm_layer_ref(x, dir_params, **_):
    if x.ndim == 4:                                   # (P, T, B, Hp) -> (T, B, P*Hp)
        P, T, B, Hp = x.shape
        x = jnp.transpose(x, (1, 2, 0, 3)).reshape(T, B, P * Hp)
    T, B, _D = x.shape
    H = dir_params[0][1].shape[1]
    dir_outs, hTs, cTs = [], [], []
    for d, (w_ih, w_hh, b) in enumerate(dir_params):
        xin = x if d == 0 else x[::-1]

        def step(carry, x_t, w_ih=w_ih, w_hh=w_hh, b=b):
            h, c = carry
            gates = x_t @ w_ih.T + h @ w_hh.T + b
            i = jax.nn.sigmoid(gates[:, :H])
            f = jax.nn.sigmoid(gates[:, H:2 * H])
            g = jnp.tanh(gates[:, 2 * H:3 * H])
            o = jax.nn.sigmoid(gates[:, 3 * H:])
            c = f * c + i * g
            h = o * jnp.tanh(c)
            return (h, c), h

        h0 = jnp.zeros((B, H), jnp.float32)
        c0 = jnp.zeros((B, H), jnp.float32)
        (hT, cT), out = lax.scan(step, (h0, c0), xin)
        if d == 1:
            out = out[::-1]
        dir_outs.append(out)
        hTs.append(hT)
        cTs.append(cT)
    return jnp.stack(dir_outs, 0), jnp.stack(hTs, 0), jnp.stack(cTs, 0)


# ------------------------------- Encoder ------------------------------------

class EncoderPallas:
    """JAX/Pallas port of onmt Encoder (single dict; eval mode, inter-layer
    dropout is a no-op at inference)."""

    def __init__(self, key, vocab_size, word_vec_size, rnn_size, layers, brnn):
        self.layers = layers
        self.num_directions = 2 if brnn else 1
        assert rnn_size % self.num_directions == 0
        self.hidden_size = rnn_size // self.num_directions
        H = self.hidden_size

        k_emb, key = jax.random.split(key)
        # word_lut: MultiWordEmbedding ~ nn.Embedding(vocab, word_vec_size)
        self.embedding = jax.random.normal(
            k_emb, (vocab_size, word_vec_size), jnp.float32) * 0.1

        # LSTM params, PyTorch layout & init (uniform(-1/sqrt(H), 1/sqrt(H)))
        self.params = []     # params[l] = [(w_ih, w_hh, b_ih+b_hh) per direction]
        stdv = 1.0 / np.sqrt(H)
        in_size = word_vec_size
        for _l in range(layers):
            dir_params = []
            for _d in range(self.num_directions):
                key, k1, k2, k3, k4 = jax.random.split(key, 5)
                w_ih = jax.random.uniform(k1, (4 * H, in_size), jnp.float32,
                                          -stdv, stdv)
                w_hh = jax.random.uniform(k2, (4 * H, H), jnp.float32,
                                          -stdv, stdv)
                b_ih = jax.random.uniform(k3, (4 * H,), jnp.float32, -stdv, stdv)
                b_hh = jax.random.uniform(k4, (4 * H,), jnp.float32, -stdv, stdv)
                dir_params.append((w_ih, w_hh, b_ih + b_hh))
            self.params.append(dir_params)
            in_size = H * self.num_directions

    def forward(self, tokens, layer_fn=lstm_layer_pallas):
        # tokens: (T, B) int32.  Embedding lookup is a gather -> plain JAX glue.
        x = jnp.take(self.embedding, tokens, axis=0)        # (T, B, E)
        h_list, c_list = [], []
        for l in range(self.layers):
            # x stays per-direction (ndir, T, B, H) between layers; the direction
            # concat is fused into the next layer's input projection.
            x, hT, cT = layer_fn(x, self.params[l])
            h_list.append(hT)
            c_list.append(cT)
        h_n = jnp.concatenate(h_list, axis=0)   # (layers*dirs, B, H) — PyTorch ordering
        c_n = jnp.concatenate(c_list, axis=0)
        ndir, T, B, H = x.shape
        outputs = jnp.transpose(x, (1, 2, 0, 3)).reshape(T, B, ndir * H)
        # TODO(synk): packed-sequence path (pack/unpack with per-example lengths)
        # has no clean Pallas equivalent; only the dense path is implemented.
        return (h_n, c_n), outputs              # (hidden_t, outputs)


# --------------------------------- main --------------------------------------

if __name__ == "__main__":
    key = jax.random.PRNGKey(0)
    k_params, k_tokens = jax.random.split(key)

    VOCAB, WORD_VEC, RNN_SIZE, LAYERS, BRNN = 50, 32, 32, 2, True
    T, B = 8, 2

    enc = EncoderPallas(k_params, VOCAB, WORD_VEC, RNN_SIZE, LAYERS, BRNN)
    tokens = jax.random.randint(k_tokens, (T, B), 0, VOCAB, dtype=jnp.int32)

    # pure-JAX lax.scan reference
    (h_ref, c_ref), out_ref = enc.forward(tokens, layer_fn=lstm_layer_ref)

    # (a) f32 Pallas path — tight numerical check of the kernel structure.
    f32_layer = lambda xx, pp: lstm_layer_pallas(xx, pp, param_dtype=jnp.float32)
    (h32, c32), o32 = enc.forward(tokens, layer_fn=f32_layer)
    jax.block_until_ready((h32, c32, o32))
    np.testing.assert_allclose(np.asarray(o32), np.asarray(out_ref), rtol=5e-5, atol=5e-5)
    np.testing.assert_allclose(np.asarray(h32), np.asarray(h_ref), rtol=5e-5, atol=5e-5)
    np.testing.assert_allclose(np.asarray(c32), np.asarray(c_ref), rtol=5e-5, atol=5e-5)

    # (b) production path: bf16 MXU operands / HBM stream, f32 accumulation & state.
    (h_n, c_n), outputs = enc.forward(tokens)
    jax.block_until_ready((h_n, c_n, outputs))
    np.testing.assert_allclose(np.asarray(outputs), np.asarray(out_ref),
                               rtol=5e-2, atol=5e-2)
    np.testing.assert_allclose(np.asarray(h_n), np.asarray(h_ref),
                               rtol=5e-2, atol=5e-2)

    assert outputs.shape == (T, B, RNN_SIZE)
    assert h_n.shape == (LAYERS * 2, B, RNN_SIZE // 2)
    assert c_n.shape == (LAYERS * 2, B, RNN_SIZE // 2)
    print("KERNEL_OK")
</pallas_src>

<mosaic_0001>
module attributes {stable_mosaic.version = 11 : i64} {
  func.func @kernel(%arg0: i32, %arg1: i32, %arg2: memref<1x8x2x64xf32, #tpu.memory_space<vmem>>, %arg3: memref<1x16x64xf32, #tpu.memory_space<vmem>>, %arg4: memref<1x8x2x16xf32, #tpu.memory_space<vmem>>, %arg5: memref<1x2x16xf32, #tpu.memory_space<vmem>>, %arg6: memref<1x2x16xf32, #tpu.memory_space<vmem>>, %arg7: memref<2x16xf32, #tpu.memory_space<vmem>>, %arg8: memref<2x16xf32, #tpu.memory_space<vmem>>) attributes {dimension_semantics = [#tpu.dimension_semantics<parallel>, #tpu.dimension_semantics<arbitrary>], iteration_bounds = array<i64: 2, 1>, scalar_prefetch = 0 : i64, scratch_operands = 2 : i64, tpu.core_type = #tpu.core_type<tc>, window_params = [{transform_indices = @transform_0, window_bounds = array<i64: 1, 8, 2, 64>}, {transform_indices = @transform_1, window_bounds = array<i64: 1, 16, 64>}, {transform_indices = @transform_2, window_bounds = array<i64: 1, 8, 2, 16>}, {transform_indices = @transform_3, window_bounds = array<i64: 1, 2, 16>}, {transform_indices = @transform_4, window_bounds = array<i64: 1, 2, 16>}]} {
    %c0_i32 = arith.constant 0 : i32
    %0 = arith.cmpi eq, %arg1, %c0_i32 : i32
    %1 = arith.extui %0 : i1 to i32
    %c0_i32_0 = arith.constant 0 : i32
    %2 = arith.cmpi ne, %1, %c0_i32_0 : i32
    scf.if %2 {
      %cst_130 = arith.constant 0.000000e+00 : f32
      %330 = vector.broadcast %cst_130 : f32 to vector<2x16xf32>
      %c0_131 = arith.constant 0 : index
      %c0_132 = arith.constant 0 : index
      %331 = vector.load %arg7[%c0_131, %c0_132] : memref<2x16xf32, #tpu.memory_space<vmem>>, vector<2x16xf32>
      tpu.vector_store %arg7[%c0_131, %c0_132], %330 {strides = array<i32>} : memref<2x16xf32, #tpu.memory_space<vmem>>, vector<2x16xf32>,
      %cst_133 = arith.constant 0.000000e+00 : f32
      %332 = vector.broadcast %cst_133 : f32 to vector<2x16xf32>
      %c0_134 = arith.constant 0 : index
      %c0_135 = arith.constant 0 : index
      %333 = vector.load %arg8[%c0_134, %c0_135] : memref<2x16xf32, #tpu.memory_space<vmem>>, vector<2x16xf32>
      tpu.vector_store %arg8[%c0_134, %c0_135], %332 {strides = array<i32>} : memref<2x16xf32, #tpu.memory_space<vmem>>, vector<2x16xf32>,
    } else {
    }
    %c0 = arith.constant 0 : index
    %c0_1 = arith.constant 0 : index
    %3 = vector.load %arg7[%c0, %c0_1] : memref<2x16xf32, #tpu.memory_space<vmem>>, vector<2x16xf32>
    %c0_2 = arith.constant 0 : index
    %c0_3 = arith.constant 0 : index
    %4 = vector.load %arg8[%c0_2, %c0_3] : memref<2x16xf32, #tpu.memory_space<vmem>>, vector<2x16xf32>
    %c0_i32_4 = arith.constant 0 : i32
    %c2_i32 = arith.constant 2 : i32
    %5 = arith.muli %c2_i32, %c0_i32_4 : i32
    %c7_i32 = arith.constant 7 : i32
    %6 = arith.subi %c7_i32, %5 : i32
    %7 = arith.muli %arg0, %6 : i32
    %8 = arith.addi %c0_i32_4, %7 : i32
    %c0_5 = arith.constant 0 : index
    %9 = arith.index_cast %8 : i32 to index
    %c0_6 = arith.constant 0 : index
    %c0_7 = arith.constant 0 : index
    %10 = vector.load %arg2[%c0_5, %9, %c0_6, %c0_7] : memref<1x8x2x64xf32, #tpu.memory_space<vmem>>, vector<1x1x2x64xf32>
    %11 = vector.shape_cast %10 : vector<1x1x2x64xf32> to vector<2x64xf32>
    %c0_8 = arith.constant 0 : index
    %c0_9 = arith.constant 0 : index
    %c0_10 = arith.constant 0 : index
    %12 = vector.load %arg3[%c0_8, %c0_9, %c0_10] : memref<1x16x64xf32, #tpu.memory_space<vmem>>, vector<1x16x64xf32>
    %13 = vector.shape_cast %12 : vector<1x16x64xf32> to vector<16x64xf32>
    %cst = arith.constant dense<0.000000e+00> : vector<2x64xf32>
    %14 = tpu.matmul %3, %13, %cst {dimension_numbers = #tpu.dot_dimension_numbers<[1], [0], [0], [1], [0, 0, 1, 1], [], []>} : vector<2x16xf32>, vector<16x64xf32>, vector<2x64xf32> -> vector<2x64xf32>
    %15 = arith.addf %11, %14 : vector<2x64xf32>
    %16 = vector.extract_strided_slice %15 {offsets = [0, 0], sizes = [2, 16], strides = [1, 1]} : vector<2x64xf32> to vector<2x16xf32>
    %17 = arith.negf %16 : vector<2x16xf32>
    %18 = math.exp %17 : vector<2x16xf32>
    %cst_11 = arith.constant 1.000000e+00 : f32
    %19 = vector.broadcast %cst_11 : f32 to vector<2x16xf32>
    %20 = arith.addf %19, %18 : vector<2x16xf32>
    %21 = arith.divf %19, %20 : vector<2x16xf32>
    %22 = vector.extract_strided_slice %15 {offsets = [0, 16], sizes = [2, 16], strides = [1, 1]} : vector<2x64xf32> to vector<2x16xf32>
    %23 = arith.negf %22 : vector<2x16xf32>
    %24 = math.exp %23 : vector<2x16xf32>
    %cst_12 = arith.constant 1.000000e+00 : f32
    %25 = vector.broadcast %cst_12 : f32 to vector<2x16xf32>
    %26 = arith.addf %25, %24 : vector<2x16xf32>
    %27 = arith.divf %25, %26 : vector<2x16xf32>
    %28 = vector.extract_strided_slice %15 {offsets = [0, 32], sizes = [2, 16], strides = [1, 1]} : vector<2x64xf32> to vector<2x16xf32>
    %29 = math.tanh %28 : vector<2x16xf32>
    %30 = vector.extract_strided_slice %15 {offsets = [0, 48], sizes = [2, 16], strides = [1, 1]} : vector<2x64xf32> to vector<2x16xf32>
    %31 = arith.negf %30 : vector<2x16xf32>
    %32 = math.exp %31 : vector<2x16xf32>
    %cst_13 = arith.constant 1.000000e+00 : f32
    %33 = vector.broadcast %cst_13 : f32 to vector<2x16xf32>
    %34 = arith.addf %33, %32 : vector<2x16xf32>
    %35 = arith.divf %33, %34 : vector<2x16xf32>
    %36 = arith.mulf %27, %4 : vector<2x16xf32>
    %37 = arith.mulf %21, %29 : vector<2x16xf32>
    %38 = arith.addf %36, %37 : vector<2x16xf32>
    %39 = math.tanh %38 : vector<2x16xf32>
    %40 = arith.mulf %35, %39 : vector<2x16xf32>
    %c0_14 = arith.constant 0 : index
    %41 = arith.index_cast %8 : i32 to index
    %c0_15 = arith.constant 0 : index
    %c0_16 = arith.constant 0 : index
    %42 = vector.load %arg4[%c0_14, %41, %c0_15, %c0_16] : memref<1x8x2x16xf32, #tpu.memory_space<vmem>>, vector<1x1x2x16xf32>
    %43 = vector.shape_cast %42 : vector<1x1x2x16xf32> to vector<2x16xf32>
    %44 = vector.shape_cast %40 : vector<2x16xf32> to vector<1x1x2x16xf32>
    tpu.vector_store %arg4[%c0_14, %41, %c0_15, %c0_16], %44 {strides = array<i32>} : memref<1x8x2x16xf32, #tpu.memory_space<vmem>>, vector<1x1x2x16xf32>,
    %c1_i32 = arith.constant 1 : i32
    %c2_i32_17 = arith.constant 2 : i32
    %45 = arith.muli %c2_i32_17, %c1_i32 : i32
    %c7_i32_18 = arith.constant 7 : i32
    %46 = arith.subi %c7_i32_18, %45 : i32
    %47 = arith.muli %arg0, %46 : i32
    %48 = arith.addi %c1_i32, %47 : i32
    %c0_19 = arith.constant 0 : index
    %49 = arith.index_cast %48 : i32 to index
    %c0_20 = arith.constant 0 : index
    %c0_21 = arith.constant 0 : index
    %50 = vector.load %arg2[%c0_19, %49, %c0_20, %c0_21] : memref<1x8x2x64xf32, #tpu.memory_space<vmem>>, vector<1x1x2x64xf32>
    %51 = vector.shape_cast %50 : vector<1x1x2x64xf32> to vector<2x64xf32>
    %c0_22 = arith.constant 0 : index
    %c0_23 = arith.constant 0 : index
    %c0_24 = arith.constant 0 : index
    %52 = vector.load %arg3[%c0_22, %c0_23, %c0_24] : memref<1x16x64xf32, #tpu.memory_space<vmem>>, vector<1x16x64xf32>
    %53 = vector.shape_cast %52 : vector<1x16x64xf32> to vector<16x64xf32>
    %cst_25 = arith.constant dense<0.000000e+00> : vector<2x64xf32>
    %54 = tpu.matmul %40, %53, %cst_25 {dimension_numbers = #tpu.dot_dimension_numbers<[1], [0], [0], [1], [0, 0, 1, 1], [], []>} : vector<2x16xf32>, vector<16x64xf32>, vector<2x64xf32> -> vector<2x64xf32>
    %55 = arith.addf %51, %54 : vector<2x64xf32>
    %56 = vector.extract_strided_slice %55 {offsets = [0, 0], sizes = [2, 16], strides = [1, 1]} : vector<2x64xf32> to vector<2x16xf32>
    %57 = arith.negf %56 : vector<2x16xf32>
    %58 = math.exp %57 : vector<2x16xf32>
    %cst_26 = arith.constant 1.000000e+00 : f32
    %59 = vector.broadcast %cst_26 : f32 to vector<2x16xf32>
    %60 = arith.addf %59, %58 : vector<2x16xf32>
    %61 = arith.divf %59, %60 : vector<2x16xf32>
    %62 = vector.extract_strided_slice %55 {offsets = [0, 16], sizes = [2, 16], strides = [1, 1]} : vector<2x64xf32> to vector<2x16xf32>
    %63 = arith.negf %62 : vector<2x16xf32>
    %64 = math.exp %63 : vector<2x16xf32>
    %cst_27 = arith.constant 1.000000e+00 : f32
    %65 = vector.broadcast %cst_27 : f32 to vector<2x16xf32>
    %66 = arith.addf %65, %64 : vector<2x16xf32>
    %67 = arith.divf %65, %66 : vector<2x16xf32>
    %68 = vector.extract_strided_slice %55 {offsets = [0, 32], sizes = [2, 16], strides = [1, 1]} : vector<2x64xf32> to vector<2x16xf32>
    %69 = math.tanh %68 : vector<2x16xf32>
    %70 = vector.extract_strided_slice %55 {offsets = [0, 48], sizes = [2, 16], strides = [1, 1]} : vector<2x64xf32> to vector<2x16xf32>
    %71 = arith.negf %70 : vector<2x16xf32>
    %72 = math.exp %71 : vector<2x16xf32>
    %cst_28 = arith.constant 1.000000e+00 : f32
    %73 = vector.broadcast %cst_28 : f32 to vector<2x16xf32>
    %74 = arith.addf %73, %72 : vector<2x16xf32>
    %75 = arith.divf %73, %74 : vector<2x16xf32>
    %76 = arith.mulf %67, %38 : vector<2x16xf32>
    %77 = arith.mulf %61, %69 : vector<2x16xf32>
    %78 = arith.addf %76, %77 : vector<2x16xf32>
    %79 = math.tanh %78 : vector<2x16xf32>
    %80 = arith.mulf %75, %79 : vector<2x16xf32>
    %c0_29 = arith.constant 0 : index
    %81 = arith.index_cast %48 : i32 to index
    %c0_30 = arith.constant 0 : index
    %c0_31 = arith.constant 0 : index
    %82 = vector.load %arg4[%c0_29, %81, %c0_30, %c0_31] : memref<1x8x2x16xf32, #tpu.memory_space<vmem>>, vector<1x1x2x16xf32>
    %83 = vector.shape_cast %82 : vector<1x1x2x16xf32> to vector<2x16xf32>
    %84 = vector.shape_cast %80 : vector<2x16xf32> to vector<1x1x2x16xf32>
    tpu.vector_store %arg4[%c0_29, %81, %c0_30, %c0_31], %84 {strides = array<i32>} : memref<1x8x2x16xf32, #tpu.memory_space<vmem>>, vector<1x1x2x16xf32>,
    %c2_i32_32 = arith.constant 2 : i32
    %c2_i32_33 = arith.constant 2 : i32
    %85 = arith.muli %c2_i32_33, %c2_i32_32 : i32
    %c7_i32_34 = arith.constant 7 : i32
    %86 = arith.subi %c7_i32_34, %85 : i32
    %87 = arith.muli %arg0, %86 : i32
    %88 = arith.addi %c2_i32_32, %87 : i32
    %c0_35 = arith.constant 0 : index
    %89 = arith.index_cast %88 : i32 to index
    %c0_36 = arith.constant 0 : index
    %c0_37 = arith.constant 0 : index
    %90 = vector.load %arg2[%c0_35, %89, %c0_36, %c0_37] : memref<1x8x2x64xf32, #tpu.memory_space<vmem>>, vector<1x1x2x64xf32>
    %91 = vector.shape_cast %90 : vector<1x1x2x64xf32> to vector<2x64xf32>
    %c0_38 = arith.constant 0 : index
    %c0_39 = arith.constant 0 : index
    %c0_40 = arith.constant 0 : index
    %92 = vector.load %arg3[%c0_38, %c0_39, %c0_40] : memref<1x16x64xf32, #tpu.memory_space<vmem>>, vector<1x16x64xf32>
    %93 = vector.shape_cast %92 : vector<1x16x64xf32> to vector<16x64xf32>
    %cst_41 = arith.constant dense<0.000000e+00> : vector<2x64xf32>
    %94 = tpu.matmul %80, %93, %cst_41 {dimension_numbers = #tpu.dot_dimension_numbers<[1], [0], [0], [1], [0, 0, 1, 1], [], []>} : vector<2x16xf32>, vector<16x64xf32>, vector<2x64xf32> -> vector<2x64xf32>
    %95 = arith.addf %91, %94 : vector<2x64xf32>
    %96 = vector.extract_strided_slice %95 {offsets = [0, 0], sizes = [2, 16], strides = [1, 1]} : vector<2x64xf32> to vector<2x16xf32>
    %97 = arith.negf %96 : vector<2x16xf32>
    %98 = math.exp %97 : vector<2x16xf32>
    %cst_42 = arith.constant 1.000000e+00 : f32
    %99 = vector.broadcast %cst_42 : f32 to vector<2x16xf32>
    %100 = arith.addf %99, %98 : vector<2x16xf32>
    %101 = arith.divf %99, %100 : vector<2x16xf32>
    %102 = vector.extract_strided_slice %95 {offsets = [0, 16], sizes = [2, 16], strides = [1, 1]} : vector<2x64xf32> to vector<2x16xf32>
    %103 = arith.negf %102 : vector<2x16xf32>
    %104 = math.exp %103 : vector<2x16xf32>
    %cst_43 = arith.constant 1.000000e+00 : f32
    %105 = vector.broadcast %cst_43 : f32 to vector<2x16xf32>
    %106 = arith.addf %105, %104 : vector<2x16xf32>
    %107 = arith.divf %105, %106 : vector<2x16xf32>
    %108 = vector.extract_strided_slice %95 {offsets = [0, 32], sizes = [2, 16], strides = [1, 1]} : vector<2x64xf32> to vector<2x16xf32>
    %109 = math.tanh %108 : vector<2x16xf32>
    %110 = vector.extract_strided_slice %95 {offsets = [0, 48], sizes = [2, 16], strides = [1, 1]} : vector<2x64xf32> to vector<2x16xf32>
    %111 = arith.negf %110 : vector<2x16xf32>
    %112 = math.exp %111 : vector<2x16xf32>
    %cst_44 = arith.constant 1.000000e+00 : f32
    %113 = vector.broadcast %cst_44 : f32 to vector<2x16xf32>
    %114 = arith.addf %113, %112 : vector<2x16xf32>
    %115 = arith.divf %113, %114 : vector<2x16xf32>
    %116 = arith.mulf %107, %78 : vector<2x16xf32>
    %117 = arith.mulf %101, %109 : vector<2x16xf32>
    %118 = arith.addf %116, %117 : vector<2x16xf32>
    %119 = math.tanh %118 : vector<2x16xf32>
    %120 = arith.mulf %115, %119 : vector<2x16xf32>
    %c0_45 = arith.constant 0 : index
    %121 = arith.index_cast %88 : i32 to index
    %c0_46 = arith.constant 0 : index
    %c0_47 = arith.constant 0 : index
    %122 = vector.load %arg4[%c0_45, %121, %c0_46, %c0_47] : memref<1x8x2x16xf32, #tpu.memory_space<vmem>>, vector<1x1x2x16xf32>
    %123 = vector.shape_cast %122 : vector<1x1x2x16xf32> to vector<2x16xf32>
    %124 = vector.shape_cast %120 : vector<2x16xf32> to vector<1x1x2x16xf32>
    tpu.vector_store %arg4[%c0_45, %121, %c0_46, %c0_47], %124 {strides = array<i32>} : memref<1x8x2x16xf32, #tpu.memory_space<vmem>>, vector<1x1x2x16xf32>,
    %c3_i32 = arith.constant 3 : i32
    %c2_i32_48 = arith.constant 2 : i32
    %125 = arith.muli %c2_i32_48, %c3_i32 : i32
    %c7_i32_49 = arith.constant 7 : i32
    %126 = arith.subi %c7_i32_49, %125 : i32
    %127 = arith.muli %arg0, %126 : i32
    %128 = arith.addi %c3_i32, %127 : i32
    %c0_50 = arith.constant 0 : index
    %129 = arith.index_cast %128 : i32 to index
    %c0_51 = arith.constant 0 : index
    %c0_52 = arith.constant 0 : index
    %130 = vector.load %arg2[%c0_50, %129, %c0_51, %c0_52] : memref<1x8x2x64xf32, #tpu.memory_space<vmem>>, vector<1x1x2x64xf32>
    %131 = vector.shape_cast %130 : vector<1x1x2x64xf32> to vector<2x64xf32>
    %c0_53 = arith.constant 0 : index
    %c0_54 = arith.constant 0 : index
    %c0_55 = arith.constant 0 : index
    %132 = vector.load %arg3[%c0_53, %c0_54, %c0_55] : memref<1x16x64xf32, #tpu.memory_space<vmem>>, vector<1x16x64xf32>
    %133 = vector.shape_cast %132 : vector<1x16x64xf32> to vector<16x64xf32>
    %cst_56 = arith.constant dense<0.000000e+00> : vector<2x64xf32>
    %134 = tpu.matmul %120, %133, %cst_56 {dimension_numbers = #tpu.dot_dimension_numbers<[1], [0], [0], [1], [0, 0, 1, 1], [], []>} : vector<2x16xf32>, vector<16x64xf32>, vector<2x64xf32> -> vector<2x64xf32>
    %135 = arith.addf %131, %134 : vector<2x64xf32>
    %136 = vector.extract_strided_slice %135 {offsets = [0, 0], sizes = [2, 16], strides = [1, 1]} : vector<2x64xf32> to vector<2x16xf32>
    %137 = arith.negf %136 : vector<2x16xf32>
    %138 = math.exp %137 : vector<2x16xf32>
    %cst_57 = arith.constant 1.000000e+00 : f32
    %139 = vector.broadcast %cst_57 : f32 to vector<2x16xf32>
    %140 = arith.addf %139, %138 : vector<2x16xf32>
    %141 = arith.divf %139, %140 : vector<2x16xf32>
    %142 = vector.extract_strided_slice %135 {offsets = [0, 16], sizes = [2, 16], strides = [1, 1]} : vector<2x64xf32> to vector<2x16xf32>
    %143 = arith.negf %142 : vector<2x16xf32>
    %144 = math.exp %143 : vector<2x16xf32>
    %cst_58 = arith.constant 1.000000e+00 : f32
    %145 = vector.broadcast %cst_58 : f32 to vector<2x16xf32>
    %146 = arith.addf %145, %144 : vector<2x16xf32>
    %147 = arith.divf %145, %146 : vector<2x16xf32>
    %148 = vector.extract_strided_slice %135 {offsets = [0, 32], sizes = [2, 16], strides = [1, 1]} : vector<2x64xf32> to vector<2x16xf32>
    %149 = math.tanh %148 : vector<2x16xf32>
    %150 = vector.extract_strided_slice %135 {offsets = [0, 48], sizes = [2, 16], strides = [1, 1]} : vector<2x64xf32> to vector<2x16xf32>
    %151 = arith.negf %150 : vector<2x16xf32>
    %152 = math.exp %151 : vector<2x16xf32>
    %cst_59 = arith.constant 1.000000e+00 : f32
    %153 = vector.broadcast %cst_59 : f32 to vector<2x16xf32>
    %154 = arith.addf %153, %152 : vector<2x16xf32>
    %155 = arith.divf %153, %154 : vector<2x16xf32>
    %156 = arith.mulf %147, %118 : vector<2x16xf32>
    %157 = arith.mulf %141, %149 : vector<2x16xf32>
    %158 = arith.addf %156, %157 : vector<2x16xf32>
    %159 = math.tanh %158 : vector<2x16xf32>
    %160 = arith.mulf %155, %159 : vector<2x16xf32>
    %c0_60 = arith.constant 0 : index
    %161 = arith.index_cast %128 : i32 to index
    %c0_61 = arith.constant 0 : index
    %c0_62 = arith.constant 0 : index
    %162 = vector.load %arg4[%c0_60, %161, %c0_61, %c0_62] : memref<1x8x2x16xf32, #tpu.memory_space<vmem>>, vector<1x1x2x16xf32>
    %163 = vector.shape_cast %162 : vector<1x1x2x16xf32> to vector<2x16xf32>
    %164 = vector.shape_cast %160 : vector<2x16xf32> to vector<1x1x2x16xf32>
    tpu.vector_store %arg4[%c0_60, %161, %c0_61, %c0_62], %164 {strides = array<i32>} : memref<1x8x2x16xf32, #tpu.memory_space<vmem>>, vector<1x1x2x16xf32>,
    %c4_i32 = arith.constant 4 : i32
    %c2_i32_63 = arith.constant 2 : i32
    %165 = arith.muli %c2_i32_63, %c4_i32 : i32
    %c7_i32_64 = arith.constant 7 : i32
    %166 = arith.subi %c7_i32_64, %165 : i32
    %167 = arith.muli %arg0, %166 : i32
    %168 = arith.addi %c4_i32, %167 : i32
    %c0_65 = arith.constant 0 : index
    %169 = arith.index_cast %168 : i32 to index
    %c0_66 = arith.constant 0 : index
    %c0_67 = arith.constant 0 : index
    %170 = vector.load %arg2[%c0_65, %169, %c0_66, %c0_67] : memref<1x8x2x64xf32, #tpu.memory_space<vmem>>, vector<1x1x2x64xf32>
    %171 = vector.shape_cast %170 : vector<1x1x2x64xf32> to vector<2x64xf32>
    %c0_68 = arith.constant 0 : index
    %c0_69 = arith.constant 0 : index
    %c0_70 = arith.constant 0 : index
    %172 = vector.load %arg3[%c0_68, %c0_69, %c0_70] : memref<1x16x64xf32, #tpu.memory_space<vmem>>, vector<1x16x64xf32>
    %173 = vector.shape_cast %172 : vector<1x16x64xf32> to vector<16x64xf32>
    %cst_71 = arith.constant dense<0.000000e+00> : vector<2x64xf32>
    %174 = tpu.matmul %160, %173, %cst_71 {dimension_numbers = #tpu.dot_dimension_numbers<[1], [0], [0], [1], [0, 0, 1, 1], [], []>} : vector<2x16xf32>, vector<16x64xf32>, vector<2x64xf32> -> vector<2x64xf32>
    %175 = arith.addf %171, %174 : vector<2x64xf32>
    %176 = vector.extract_strided_slice %175 {offsets = [0, 0], sizes = [2, 16], strides = [1, 1]} : vector<2x64xf32> to vector<2x16xf32>
    %177 = arith.negf %176 : vector<2x16xf32>
    %178 = math.exp %177 : vector<2x16xf32>
    %cst_72 = arith.constant 1.000000e+00 : f32
    %179 = vector.broadcast %cst_72 : f32 to vector<2x16xf32>
    %180 = arith.addf %179, %178 : vector<2x16xf32>
    %181 = arith.divf %179, %180 : vector<2x16xf32>
    %182 = vector.extract_strided_slice %175 {offsets = [0, 16], sizes = [2, 16], strides = [1, 1]} : vector<2x64xf32> to vector<2x16xf32>
    %183 = arith.negf %182 : vector<2x16xf32>
    %184 = math.exp %183 : vector<2x16xf32>
    %cst_73 = arith.constant 1.000000e+00 : f32
    %185 = vector.broadcast %cst_73 : f32 to vector<2x16xf32>
    %186 = arith.addf %185, %184 : vector<2x16xf32>
    %187 = arith.divf %185, %186 : vector<2x16xf32>
    %188 = vector.extract_strided_slice %175 {offsets = [0, 32], sizes = [2, 16], strides = [1, 1]} : vector<2x64xf32> to vector<2x16xf32>
    %189 = math.tanh %188 : vector<2x16xf32>
    %190 = vector.extract_strided_slice %175 {offsets = [0, 48], sizes = [2, 16], strides = [1, 1]} : vector<2x64xf32> to vector<2x16xf32>
    %191 = arith.negf %190 : vector<2x16xf32>
    %192 = math.exp %191 : vector<2x16xf32>
    %cst_74 = arith.constant 1.000000e+00 : f32
    %193 = vector.broadcast %cst_74 : f32 to vector<2x16xf32>
    %194 = arith.addf %193, %192 : vector<2x16xf32>
    %195 = arith.divf %193, %194 : vector<2x16xf32>
    %196 = arith.mulf %187, %158 : vector<2x16xf32>
    %197 = arith.mulf %181, %189 : vector<2x16xf32>
    %198 = arith.addf %196, %197 : vector<2x16xf32>
    %199 = math.tanh %198 : vector<2x16xf32>
    %200 = arith.mulf %195, %199 : vector<2x16xf32>
    %c0_75 = arith.constant 0 : index
    %201 = arith.index_cast %168 : i32 to index
    %c0_76 = arith.constant 0 : index
    %c0_77 = arith.constant 0 : index
    %202 = vector.load %arg4[%c0_75, %201, %c0_76, %c0_77] : memref<1x8x2x16xf32, #tpu.memory_space<vmem>>, vector<1x1x2x16xf32>
    %203 = vector.shape_cast %202 : vector<1x1x2x16xf32> to vector<2x16xf32>
    %204 = vector.shape_cast %200 : vector<2x16xf32> to vector<1x1x2x16xf32>
    tpu.vector_store %arg4[%c0_75, %201, %c0_76, %c0_77], %204 {strides = array<i32>} : memref<1x8x2x16xf32, #tpu.memory_space<vmem>>, vector<1x1x2x16xf32>,
    %c5_i32 = arith.constant 5 : i32
    %c2_i32_78 = arith.constant 2 : i32
    %205 = arith.muli %c2_i32_78, %c5_i32 : i32
    %c7_i32_79 = arith.constant 7 : i32
    %206 = arith.subi %c7_i32_79, %205 : i32
    %207 = arith.muli %arg0, %206 : i32
    %208 = arith.addi %c5_i32, %207 : i32
    %c0_80 = arith.constant 0 : index
    %209 = arith.index_cast %208 : i32 to index
    %c0_81 = arith.constant 0 : index
    %c0_82 = arith.constant 0 : index
    %210 = vector.load %arg2[%c0_80, %209, %c0_81, %c0_82] : memref<1x8x2x64xf32, #tpu.memory_space<vmem>>, vector<1x1x2x64xf32>
    %211 = vector.shape_cast %210 : vector<1x1x2x64xf32> to vector<2x64xf32>
    %c0_83 = arith.constant 0 : index
    %c0_84 = arith.constant 0 : index
    %c0_85 = arith.constant 0 : index
    %212 = vector.load %arg3[%c0_83, %c0_84, %c0_85] : memref<1x16x64xf32, #tpu.memory_space<vmem>>, vector<1x16x64xf32>
    %213 = vector.shape_cast %212 : vector<1x16x64xf32> to vector<16x64xf32>
    %cst_86 = arith.constant dense<0.000000e+00> : vector<2x64xf32>
    %214 = tpu.matmul %200, %213, %cst_86 {dimension_numbers = #tpu.dot_dimension_numbers<[1], [0], [0], [1], [0, 0, 1, 1], [], []>} : vector<2x16xf32>, vector<16x64xf32>, vector<2x64xf32> -> vector<2x64xf32>
    %215 = arith.addf %211, %214 : vector<2x64xf32>
    %216 = vector.extract_strided_slice %215 {offsets = [0, 0], sizes = [2, 16], strides = [1, 1]} : vector<2x64xf32> to vector<2x16xf32>
    %217 = arith.negf %216 : vector<2x16xf32>
    %218 = math.exp %217 : vector<2x16xf32>
    %cst_87 = arith.constant 1.000000e+00 : f32
    %219 = vector.broadcast %cst_87 : f32 to vector<2x16xf32>
    %220 = arith.addf %219, %218 : vector<2x16xf32>
    %221 = arith.divf %219, %220 : vector<2x16xf32>
    %222 = vector.extract_strided_slice %215 {offsets = [0, 16], sizes = [2, 16], strides = [1, 1]} : vector<2x64xf32> to vector<2x16xf32>
    %223 = arith.negf %222 : vector<2x16xf32>
    %224 = math.exp %223 : vector<2x16xf32>
    %cst_88 = arith.constant 1.000000e+00 : f32
    %225 = vector.broadcast %cst_88 : f32 to vector<2x16xf32>
    %226 = arith.addf %225, %224 : vector<2x16xf32>
    %227 = arith.divf %225, %226 : vector<2x16xf32>
    %228 = vector.extract_strided_slice %215 {offsets = [0, 32], sizes = [2, 16], strides = [1, 1]} : vector<2x64xf32> to vector<2x16xf32>
    %229 = math.tanh %228 : vector<2x16xf32>
    %230 = vector.extract_strided_slice %215 {offsets = [0, 48], sizes = [2, 16], strides = [1, 1]} : vector<2x64xf32> to vector<2x16xf32>
    %231 = arith.negf %230 : vector<2x16xf32>
    %232 = math.exp %231 : vector<2x16xf32>
    %cst_89 = arith.constant 1.000000e+00 : f32
    %233 = vector.broadcast %cst_89 : f32 to vector<2x16xf32>
    %234 = arith.addf %233, %232 : vector<2x16xf32>
    %235 = arith.divf %233, %234 : vector<2x16xf32>
    %236 = arith.mulf %227, %198 : vector<2x16xf32>
    %237 = arith.mulf %221, %229 : vector<2x16xf32>
    %238 = arith.addf %236, %237 : vector<2x16xf32>
    %239 = math.tanh %238 : vector<2x16xf32>
    %240 = arith.mulf %235, %239 : vector<2x16xf32>
    %c0_90 = arith.constant 0 : index
    %241 = arith.index_cast %208 : i32 to index
    %c0_91 = arith.constant 0 : index
    %c0_92 = arith.constant 0 : index
    %242 = vector.load %arg4[%c0_90, %241, %c0_91, %c0_92] : memref<1x8x2x16xf32, #tpu.memory_space<vmem>>, vector<1x1x2x16xf32>
    %243 = vector.shape_cast %242 : vector<1x1x2x16xf32> to vector<2x16xf32>
    %244 = vector.shape_cast %240 : vector<2x16xf32> to vector<1x1x2x16xf32>
    tpu.vector_store %arg4[%c0_90, %241, %c0_91, %c0_92], %244 {strides = array<i32>} : memref<1x8x2x16xf32, #tpu.memory_space<vmem>>, vector<1x1x2x16xf32>,
    %c6_i32 = arith.constant 6 : i32
    %c2_i32_93 = arith.constant 2 : i32
    %245 = arith.muli %c2_i32_93, %c6_i32 : i32
    %c7_i32_94 = arith.constant 7 : i32
    %246 = arith.subi %c7_i32_94, %245 : i32
    %247 = arith.muli %arg0, %246 : i32
    %248 = arith.addi %c6_i32, %247 : i32
    %c0_95 = arith.constant 0 : index
    %249 = arith.index_cast %248 : i32 to index
    %c0_96 = arith.constant 0 : index
    %c0_97 = arith.constant 0 : index
    %250 = vector.load %arg2[%c0_95, %249, %c0_96, %c0_97] : memref<1x8x2x64xf32, #tpu.memory_space<vmem>>, vector<1x1x2x64xf32>
    %251 = vector.shape_cast %250 : vector<1x1x2x64xf32> to vector<2x64xf32>
    %c0_98 = arith.constant 0 : index
    %c0_99 = arith.constant 0 : index
    %c0_100 = arith.constant 0 : index
    %252 = vector.load %arg3[%c0_98, %c0_99, %c0_100] : memref<1x16x64xf32, #tpu.memory_space<vmem>>, vector<1x16x64xf32>
    %253 = vector.shape_cast %252 : vector<1x16x64xf32> to vector<16x64xf32>
    %cst_101 = arith.constant dense<0.000000e+00> : vector<2x64xf32>
    %254 = tpu.matmul %240, %253, %cst_101 {dimension_numbers = #tpu.dot_dimension_numbers<[1], [0], [0], [1], [0, 0, 1, 1], [], []>} : vector<2x16xf32>, vector<16x64xf32>, vector<2x64xf32> -> vector<2x64xf32>
    %255 = arith.addf %251, %254 : vector<2x64xf32>
    %256 = vector.extract_strided_slice %255 {offsets = [0, 0], sizes = [2, 16], strides = [1, 1]} : vector<2x64xf32> to vector<2x16xf32>
    %257 = arith.negf %256 : vector<2x16xf32>
    %258 = math.exp %257 : vector<2x16xf32>
    %cst_102 = arith.constant 1.000000e+00 : f32
    %259 = vector.broadcast %cst_102 : f32 to vector<2x16xf32>
    %260 = arith.addf %259, %258 : vector<2x16xf32>
    %261 = arith.divf %259, %260 : vector<2x16xf32>
    %262 = vector.extract_strided_slice %255 {offsets = [0, 16], sizes = [2, 16], strides = [1, 1]} : vector<2x64xf32> to vector<2x16xf32>
    %263 = arith.negf %262 : vector<2x16xf32>
    %264 = math.exp %263 : vector<2x16xf32>
    %cst_103 = arith.constant 1.000000e+00 : f32
    %265 = vector.broadcast %cst_103 : f32 to vector<2x16xf32>
    %266 = arith.addf %265, %264 : vector<2x16xf32>
    %267 = arith.divf %265, %266 : vector<2x16xf32>
    %268 = vector.extract_strided_slice %255 {offsets = [0, 32], sizes = [2, 16], strides = [1, 1]} : vector<2x64xf32> to vector<2x16xf32>
    %269 = math.tanh %268 : vector<2x16xf32>
    %270 = vector.extract_strided_slice %255 {offsets = [0, 48], sizes = [2, 16], strides = [1, 1]} : vector<2x64xf32> to vector<2x16xf32>
    %271 = arith.negf %270 : vector<2x16xf32>
    %272 = math.exp %271 : vector<2x16xf32>
    %cst_104 = arith.constant 1.000000e+00 : f32
    %273 = vector.broadcast %cst_104 : f32 to vector<2x16xf32>
    %274 = arith.addf %273, %272 : vector<2x16xf32>
    %275 = arith.divf %273, %274 : vector<2x16xf32>
    %276 = arith.mulf %267, %238 : vector<2x16xf32>
    %277 = arith.mulf %261, %269 : vector<2x16xf32>
    %278 = arith.addf %276, %277 : vector<2x16xf32>
    %279 = math.tanh %278 : vector<2x16xf32>
    %280 = arith.mulf %275, %279 : vector<2x16xf32>
    %c0_105 = arith.constant 0 : index
    %281 = arith.index_cast %248 : i32 to index
    %c0_106 = arith.constant 0 : index
    %c0_107 = arith.constant 0 : index
    %282 = vector.load %arg4[%c0_105, %281, %c0_106, %c0_107] : memref<1x8x2x16xf32, #tpu.memory_space<vmem>>, vector<1x1x2x16xf32>
    %283 = vector.shape_cast %282 : vector<1x1x2x16xf32> to vector<2x16xf32>
    %284 = vector.shape_cast %280 : vector<2x16xf32> to vector<1x1x2x16xf32>
    tpu.vector_store %arg4[%c0_105, %281, %c0_106, %c0_107], %284 {strides = array<i32>} : memref<1x8x2x16xf32, #tpu.memory_space<vmem>>, vector<1x1x2x16xf32>,
    %c7_i32_108 = arith.constant 7 : i32
    %c2_i32_109 = arith.constant 2 : i32
    %285 = arith.muli %c2_i32_109, %c7_i32_108 : i32
    %c7_i32_110 = arith.constant 7 : i32
    %286 = arith.subi %c7_i32_110, %285 : i32
    %287 = arith.muli %arg0, %286 : i32
    %288 = arith.addi %c7_i32_108, %287 : i32
    %c0_111 = arith.constant 0 : index
    %289 = arith.index_cast %288 : i32 to index
    %c0_112 = arith.constant 0 : index
    %c0_113 = arith.constant 0 : index
    %290 = vector.load %arg2[%c0_111, %289, %c0_112, %c0_113] : memref<1x8x2x64xf32, #tpu.memory_space<vmem>>, vector<1x1x2x64xf32>
    %291 = vector.shape_cast %290 : vector<1x1x2x64xf32> to vector<2x64xf32>
    %c0_114 = arith.constant 0 : index
    %c0_115 = arith.constant 0 : index
    %c0_116 = arith.constant 0 : index
    %292 = vector.load %arg3[%c0_114, %c0_115, %c0_116] : memref<1x16x64xf32, #tpu.memory_space<vmem>>, vector<1x16x64xf32>
    %293 = vector.shape_cast %292 : vector<1x16x64xf32> to vector<16x64xf32>
    %cst_117 = arith.constant dense<0.000000e+00> : vector<2x64xf32>
    %294 = tpu.matmul %280, %293, %cst_117 {dimension_numbers = #tpu.dot_dimension_numbers<[1], [0], [0], [1], [0, 0, 1, 1], [], []>} : vector<2x16xf32>, vector<16x64xf32>, vector<2x64xf32> -> vector<2x64xf32>
    %295 = arith.addf %291, %294 : vector<2x64xf32>
    %296 = vector.extract_strided_slice %295 {offsets = [0, 0], sizes = [2, 16], strides = [1, 1]} : vector<2x64xf32> to vector<2x16xf32>
    %297 = arith.negf %296 : vector<2x16xf32>
    %298 = math.exp %297 : vector<2x16xf32>
    %cst_118 = arith.constant 1.000000e+00 : f32
    %299 = vector.broadcast %cst_118 : f32 to vector<2x16xf32>
    %300 = arith.addf %299, %298 : vector<2x16xf32>
    %301 = arith.divf %299, %300 : vector<2x16xf32>
    %302 = vector.extract_strided_slice %295 {offsets = [0, 16], sizes = [2, 16], strides = [1, 1]} : vector<2x64xf32> to vector<2x16xf32>
    %303 = arith.negf %302 : vector<2x16xf32>
    %304 = math.exp %303 : vector<2x16xf32>
    %cst_119 = arith.constant 1.000000e+00 : f32
    %305 = vector.broadcast %cst_119 : f32 to vector<2x16xf32>
    %306 = arith.addf %305, %304 : vector<2x16xf32>
    %307 = arith.divf %305, %306 : vector<2x16xf32>
    %308 = vector.extract_strided_slice %295 {offsets = [0, 32], sizes = [2, 16], strides = [1, 1]} : vector<2x64xf32> to vector<2x16xf32>
    %309 = math.tanh %308 : vector<2x16xf32>
    %310 = vector.extract_strided_slice %295 {offsets = [0, 48], sizes = [2, 16], strides = [1, 1]} : vector<2x64xf32> to vector<2x16xf32>
    %311 = arith.negf %310 : vector<2x16xf32>
    %312 = math.exp %311 : vector<2x16xf32>
    %cst_120 = arith.constant 1.000000e+00 : f32
    %313 = vector.broadcast %cst_120 : f32 to vector<2x16xf32>
    %314 = arith.addf %313, %312 : vector<2x16xf32>
    %315 = arith.divf %313, %314 : vector<2x16xf32>
    %316 = arith.mulf %307, %278 : vector<2x16xf32>
    %317 = arith.mulf %301, %309 : vector<2x16xf32>
    %318 = arith.addf %316, %317 : vector<2x16xf32>
    %319 = math.tanh %318 : vector<2x16xf32>
    %320 = arith.mulf %315, %319 : vector<2x16xf32>
    %c0_121 = arith.constant 0 : index
    %321 = arith.index_cast %288 : i32 to index
    %c0_122 = arith.constant 0 : index
    %c0_123 = arith.constant 0 : index
    %322 = vector.load %arg4[%c0_121, %321, %c0_122, %c0_123] : memref<1x8x2x16xf32, #tpu.memory_space<vmem>>, vector<1x1x2x16xf32>
    %323 = vector.shape_cast %322 : vector<1x1x2x16xf32> to vector<2x16xf32>
    %324 = vector.shape_cast %320 : vector<2x16xf32> to vector<1x1x2x16xf32>
    tpu.vector_store %arg4[%c0_121, %321, %c0_122, %c0_123], %324 {strides = array<i32>} : memref<1x8x2x16xf32, #tpu.memory_space<vmem>>, vector<1x1x2x16xf32>,
    %c8_i32 = arith.constant 8 : i32
    %c0_124 = arith.constant 0 : index
    %c0_125 = arith.constant 0 : index
    %325 = vector.load %arg7[%c0_124, %c0_125] : memref<2x16xf32, #tpu.memory_space<vmem>>, vector<2x16xf32>
    tpu.vector_store %arg7[%c0_124, %c0_125], %320 {strides = array<i32>} : memref<2x16xf32, #tpu.memory_space<vmem>>, vector<2x16xf32>,
    %c0_126 = arith.constant 0 : index
    %c0_127 = arith.constant 0 : index
    %326 = vector.load %arg8[%c0_126, %c0_127] : memref<2x16xf32, #tpu.memory_space<vmem>>, vector<2x16xf32>
    tpu.vector_store %arg8[%c0_126, %c0_127], %318 {strides = array<i32>} : memref<2x16xf32, #tpu.memory_space<vmem>>, vector<2x16xf32>,
    %c0_i32_128 = arith.constant 0 : i32
    %327 = arith.cmpi eq, %arg1, %c0_i32_128 : i32
    %328 = arith.extui %327 : i1 to i32
    %c0_i32_129 = arith.constant 0 : i32
    %329 = arith.cmpi ne, %328, %c0_i32_129 : i32
    scf.if %329 {
      %c0_130 = arith.constant 0 : index
      %c0_131 = arith.constant 0 : index
      %c0_132 = arith.constant 0 : index
      %330 = vector.load %arg5[%c0_130, %c0_131, %c0_132] : memref<1x2x16xf32, #tpu.memory_space<vmem>>, vector<1x2x16xf32>
      %331 = vector.shape_cast %330 : vector<1x2x16xf32> to vector<2x16xf32>
      %332 = vector.shape_cast %320 : vector<2x16xf32> to vector<1x2x16xf32>
      tpu.vector_store %arg5[%c0_130, %c0_131, %c0_132], %332 {strides = array<i32>} : memref<1x2x16xf32, #tpu.memory_space<vmem>>, vector<1x2x16xf32>,
      %c0_133 = arith.constant 0 : index
      %c0_134 = arith.constant 0 : index
      %c0_135 = arith.constant 0 : index
      %333 = vector.load %arg6[%c0_133, %c0_134, %c0_135] : memref<1x2x16xf32, #tpu.memory_space<vmem>>, vector<1x2x16xf32>
      %334 = vector.shape_cast %333 : vector<1x2x16xf32> to vector<2x16xf32>
      %335 = vector.shape_cast %318 : vector<2x16xf32> to vector<1x2x16xf32>
      tpu.vector_store %arg6[%c0_133, %c0_134, %c0_135], %335 {strides = array<i32>} : memref<1x2x16xf32, #tpu.memory_space<vmem>>, vector<1x2x16xf32>,
    } else {
    }
    return
  }
  func.func @transform_0(%arg0: i32, %arg1: i32) -> (i32, i32, i32, i32) {
    %c2_i32 = arith.constant 2 : i32
    %0 = arith.muli %c2_i32, %arg1 : i32
    %c0_i32 = arith.constant 0 : i32
    %1 = arith.subi %c0_i32, %0 : i32
    %2 = arith.muli %arg0, %1 : i32
    %3 = arith.addi %arg1, %2 : i32
    %c0_i32_0 = arith.constant 0 : i32
    %c0_i32_1 = arith.constant 0 : i32
    %c0_i32_2 = arith.constant 0 : i32
    return %arg0, %3, %c0_i32_0, %c0_i32_1 : i32, i32, i32, i32
  }
  func.func @transform_1(%arg0: i32, %arg1: i32) -> (i32, i32, i32) {
    %c0_i32 = arith.constant 0 : i32
    %c0_i32_0 = arith.constant 0 : i32
    %c0_i32_1 = arith.constant 0 : i32
    return %arg0, %c0_i32, %c0_i32_0 : i32, i32, i32
  }
  func.func @transform_2(%arg0: i32, %arg1: i32) -> (i32, i32, i32, i32) {
    %c2_i32 = arith.constant 2 : i32
    %0 = arith.muli %c2_i32, %arg1 : i32
    %c0_i32 = arith.constant 0 : i32
    %1 = arith.subi %c0_i32, %0 : i32
    %2 = arith.muli %arg0, %1 : i32
    %3 = arith.addi %arg1, %2 : i32
    %c0_i32_0 = arith.constant 0 : i32
    %c0_i32_1 = arith.constant 0 : i32
    %c0_i32_2 = arith.constant 0 : i32
    return %arg0, %3, %c0_i32_0, %c0_i32_1 : i32, i32, i32, i32
  }
  func.func @transform_3(%arg0: i32, %arg1: i32) -> (i32, i32, i32) {
    %c0_i32 = arith.constant 0 : i32
    %c0_i32_0 = arith.constant 0 : i32
    %c0_i32_1 = arith.constant 0 : i32
    return %arg0, %c0_i32, %c0_i32_0 : i32, i32, i32
  }
  func.func @transform_4(%arg0: i32, %arg1: i32) -> (i32, i32, i32) {
    %c0_i32 = arith.constant 0 : i32
    %c0_i32_0 = arith.constant 0 : i32
    %c0_i32_1 = arith.constant 0 : i32
    return %arg0, %c0_i32, %c0_i32_0 : i32, i32, i32
  }
}

</mosaic_0001>

<bundles_post_ra>
// kernel: tpu_custom_call.1
= control target key start
LH: loop header
LB: loop body
LE: loop exit
PB: predicated region body
PF: predicated region fallthrough
CT: control target
= control target key end

     0   :  { %s2528_s0 = inlined_call_operand.hbm [shape: f32[2,8,2,64], index: 0, kind: input, shape index: {}]   ;;  %s2529_s1 = inlined_call_operand.hbm [shape: f32[2,16,64], index: 1, kind: input, shape index: {}]   ;;  %s2530_s2 = inlined_call_operand.hbm [shape: f32[2,8,2,16], index: 2, kind: output, shape index: {0}]   ;;  %s2531_s3 = inlined_call_operand.hbm [shape: f32[2,2,16], index: 3, kind: output, shape index: {1}]   ;;  %s2532_s4 = inlined_call_operand.hbm [shape: f32[2,2,16], index: 4, kind: output, shape index: {2}]  }
   0x1   :  { %2537 = sst [smem:[#allocation17_spill]] %s2528_s0 }
   0x2   :  { %2538 = sst [smem:[#allocation18_spill]] %s2529_s1 }
   0x3   :  { %10 = vsyncpa [#allocation5], 0 }
   0x4   :  { %12 = vsyncpa [#allocation5 + $0x1], 0 }
   0x5   :  { %13 = vsyncpa [#allocation8], 0 }
   0x6   :  { %15 = vsyncpa [#allocation8 + $0x1], 0 }
   0x7   :  { %16 = vsyncpa [#allocation6], 0 }
   0x8   :  { %18 = vsyncpa [#allocation6 + $0x1], 0 }
   0x9   :  { %19 = vsyncpa [#allocation11], 0 }
   0xa   :  { %21 = vsyncpa [#allocation11 + $0x1], 0  ;;  %s2088_s15 = smov 0   ;;  %s2090_s16 = smov 0  }
   0xb   :  { %s2092_s17 = smov 0   ;;  %s2094_s18 = smov 0  }
   0xc   :  { %s2096_s19 = smov 0   ;;  %s2098_s20 = smov 0  }
   0xd LB: > { %s2119_s21 = sadd.s32 4294967295, %s2043_s20   ;;  %s2533_s22 = sadd.s32 4294967294, %s2043_s20   ;;  %s2043_s20 = sphi %s2098_s20, %s27_s20   ;;  %s2039_s19 = sphi %s2096_s19, %s2558_s19   ;;  %s2035_s18 = sphi %s2094_s18, %s2557_s18   ;;  %s2031_s17 = sphi %s2092_s17, %s2556_s17   ;;  %s2027_s16 = sphi %s2090_s16, %s2555_s16   ;;  %s2023_s15 = sphi %s2088_s15, %s2554_s15  }
   0xe   : > { %s39_s23 = sadd.s32 1, %s2039_s19  ;;  %s56_s24 = sadd.s32 1, %s2031_s17 }
   0xf   : > { %p41_p0 = scmp.ge.s32.totalorder %s39_s23, 2  ;;  %p63_p1 = scmp.ne.s32.totalorder %s2031_s17, %s2027_s16 }
  0x10   : > { %p64_p2 = scmp.eq.s32.totalorder %s2043_s20, 0  ;;  %p69_p3 = scmp.ne.s32.totalorder %s2027_s16, %s2023_s15 }
  0x11   : > { %s2560_s23 = smov (%p41_p0, %s39_s23), 0  ;;  %p70_p5 = scmp.eq.s32.totalorder %s2119_s21, 0 }
  0x12   : > { %p2131_p4 = por %p64_p2, %p63_p1  ;;  %s51_s26 = ssub.s32 %s2039_s19, %s2560_s23 }
  0x13   : > { %p129_p6 = scmp.eq.s32.totalorder %s2119_s21, 1  ;;  %p54_p7 = scmp.eq.s32.totalorder %s51_s26, 0 }
  0x14   : > { %p2139_p8 = por %p70_p5, %p69_p3  ;;  %p135_p10 = scmp.eq.s32.totalorder %s2533_s22, 1 }
  0x15   : > { %p2143_p9 = por %p129_p6, %p63_p1  ;;  %p1710_p13 = scmp.lt.s32.totalorder %s2043_s20, 2 }
  0x16   : > { %s2540_s27 = scalar_select %p2139_p8, 1, 0 }
  0x17   : > { %s2541_s28 = scalar_select %p2143_p9, 1, 0 }
  0x18   : > { %s2150_s29 = scalar_select %p54_p7, %s2031_s17, %s56_s24  }
  0x19   : > { %p2152_p11 = por %p135_p10, %p69_p3  ;;  %s2159_s5 = sand.u32 1, %s2031_s17  }
  0x1a   : > { %s1513_s6 = sshll.u32 %s2159_s5, 4  ;;  %s1576_s7 = sshll.u32 %s2039_s19, 8 }
  0x1b   : > { %s2542_s30 = scalar_select %p2152_p11, 1, 0 }
  0x1c   : > { %s2543_s0 = sld [smem:[#allocation17_spill]]  ;;  %s211_s11 = scalar_lea.vmem [#allocation4], %s1513_s6 }
  0x1d   : > { %s224_s12 = sshll.u32 %s211_s11, 4  ;;  %p2176_p0 = pnand %p1710_p13, %p2131_p4  ;;  %s2172_s12 = int_to_ptr.vmem [resolvable:$true] %s224_s12 }
  0x1e   : > { %s208_s14 = scalar_lea.sflag [#allocation5], %s2159_s5 }
  0x1f   : > { %p1839_p3 = pneg %p2176_p0 }
  0x22   : > { %s2168_s10 = scalar_lea.hbm %s2543_s0, %s1576_s7  ;;  %s1842_s25 = scalar_lea.hbm %s2543_s0, 512 }
  0x23   : > { %s1837_s24 = scalar_lea.hbm %s2168_s10, 256  ;;  %p1843_p4 = scmp.lt.u32.totalorder %s2168_s10, %s2543_s0 }
  0x24   : > { %p1838_p2 = scmp.ne.s32.totalorder %s2168_s10, %s1837_s24  ;;  %p1844_p7 = scmp.lt.u32.totalorder %s1842_s25, %s1837_s24 }
  0x25   : > { %p1846_p13 = scmp.lt.u32.totalorder %s1837_s24, %s2168_s10 }
  0x26   : > { %p1840_p5 = pnand %p1839_p3, %p1838_p2  ;;  %p1845_p10 = por %p1844_p7, %p1843_p4 }
  0x28   : > { %p1841_p6 = pneg %p1840_p5  ;;  %p1847_p12 = por %p1846_p13, %p1845_p10 }
  0x2a   : > { %p1848_p1 = pnand %p1847_p12, %p1841_p6 }
  0x2c   : > { %1851 = shalt.err (!%p1848_p1)
}
  0x2d   : > { %s1852_s22 = scalar_lea.vmem %s2172_s12, 256  ;;  %s2045_s26 = smov [#allocation4]  }
  0x2e   : > { %p1853_p2 = scmp.ne.s32.totalorder %s2172_s12, %s1852_s22  ;;  %s1857_s8 = sshll.u32 %s2045_s26, 4  ;;  %s1858_s8 = int_to_ptr.vmem [resolvable:$false] %s1857_s8 }
  0x2f   : > { %s1859_s9 = scalar_lea.vmem %s1858_s8, 512  ;;  %p1860_p9 = scmp.lt.s32.totalorder %s2172_s12, %s1858_s8 }
  0x30   : > { %p1855_p5 = pnand %p1853_p2, %p1839_p3  ;;  %p1861_p4 = scmp.lt.s32.totalorder %s1859_s9, %s1852_s22 }
  0x32   : > { %p1856_p11 = pneg %p1855_p5  ;;  %p1862_p7 = por %p1861_p4, %p1860_p9 }
  0x34   : > { %p1863_p10 = pnand %p1862_p7, %p1856_p11 }
  0x36   : > { %1866 = shalt.err (!%p1863_p10)
}
  0x37   : > { %s2046_s24 = smov 32   ;;  %s2047_s25 = smov 2  }
  0x38   : > { %1696 = dma.hbm_to_vmem [thread:$0]  (!%p2176_p0), %s2168_s10, 256, %s2172_s12, %s208_s14, %s2046_s24, %s2046_s24, %s2047_s25  }
  0x39   : > { %p253_p12 = scmp.lt.s32.totalorder %s2043_s20, 3  ;;  %s2545_s1 = sld [smem:[#allocation18_spill]] }
  0x3a   : > { %p2546_p9 = scmp.ge.s32.totalorder %s2043_s20, 1  ;;  %s238_s9 = scalar_lea.vmem [#allocation7], %s1513_s6 }
  0x3b   : > { %s245_s0 = sshll.u32 %s238_s9, 4  ;;  %s235_s10 = scalar_lea.sflag [#allocation8], %s2159_s5  ;;  %s2225_s0 = int_to_ptr.vmem [resolvable:$true] %s245_s0 }
  0x3c   : > { %p2219_p11 = pnand %p2546_p9, %p253_p12 }
  0x3f   : > { %s2215_s26 = scalar_lea.hbm %s2545_s1, %s1576_s7  ;;  %s1872_s24 = scalar_lea.hbm %s2545_s1, 512 }
  0x40   : > { %s1867_s12 = scalar_lea.hbm %s2215_s26, 256  ;;  %p1873_p2 = scmp.lt.u32.totalorder %s2215_s26, %s2545_s1 }
  0x41   : > { %p1868_p1 = scmp.ne.s32.totalorder %s2215_s26, %s1867_s12  ;;  %p1874_p5 = scmp.lt.u32.totalorder %s1872_s24, %s1867_s12 }
  0x42   : > { %p1876_p7 = scmp.lt.u32.totalorder %s1867_s12, %s2215_s26 }
  0x43   : > { %p1870_p6 = pnand %p1868_p1, %p1839_p3  ;;  %p1875_p4 = por %p1874_p5, %p1873_p2 }
  0x45   : > { %p1871_p13 = pneg %p1870_p6  ;;  %p1877_p10 = por %p1876_p7, %p1875_p4 }
  0x47   : > { %p1878_p12 = pnand %p1877_p10, %p1871_p13 }
  0x49   : > { %1881 = shalt.err (!%p1878_p12)
}
  0x4a   : > { %s1882_s6 = scalar_lea.vmem %s2225_s0, 256  ;;  %s2048_s11 = smov [#allocation7]  }
  0x4b   : > { %p1883_p9 = scmp.ne.s32.totalorder %s2225_s0, %s1882_s6  ;;  %s1887_s9 = sshll.u32 %s2048_s11, 4  ;;  %s1888_s9 = int_to_ptr.vmem [resolvable:$false] %s1887_s9 }
  0x4c   : > { %s1889_s7 = scalar_lea.vmem %s1888_s9, 512  ;;  %p1890_p8 = scmp.lt.s32.totalorder %s2225_s0, %s1888_s9 }
  0x4d   : > { %p1885_p1 = pnand %p1883_p9, %p1839_p3  ;;  %p1891_p2 = scmp.lt.s32.totalorder %s1889_s7, %s1882_s6 }
  0x4f   : > { %p1886_p6 = pneg %p1885_p1  ;;  %p1892_p5 = por %p1891_p2, %p1890_p8 }
  0x51   : > { %p1893_p4 = pnand %p1892_p5, %p1886_p6 }
  0x53   : > { %1896 = shalt.err (!%p1893_p4)
}
  0x54   : > { %s2049_s12 = smov 128   ;;  %s2050_s14 = smov 8  }
  0x55   : > { %1699 = dma.hbm_to_vmem [thread:$0]  (!%p2176_p0), %s2215_s26, 256, %s2225_s0, %s235_s10, %s2049_s12, %s2049_s12, %s2050_s14  }
  0x56   : > { %257 = sbr.rel (%p2219_p11) target bundleno = 5788 (0x169c), region = 28  ;;  %s2256_s24 = sand.u32 (!%p2219_p11), 1, %s2027_s16  }
  0x57   : > { %s2259_s25 = sshll.u32 (!%p2219_p11), %s2256_s24, 4  ;;  %s260_s22 = scalar_lea.sflag (!%p2219_p11), [#allocation5], %s2256_s24 }
  0x58   : > { %s2263_s6 = scalar_lea.vmem (!%p2219_p11), [#allocation4], %s2259_s25  ;;  %p2548_p8 = scmp.ne.s32.totalorder (!%p2219_p11), %s2540_s27, 0 }
  0x5d   : > { %2006 = dma.done.wait (%p2548_p8), %s260_s22, 256  }
  0x5e   : > { %2008 = vsyncadd (%p2548_p8), %s260_s22, 4294967040  ;;  %s269_s0 = scalar_lea.sflag [#allocation8], %s2256_s24  ;;  %s272_s5 = scalar_lea.vmem [#allocation7], %s2259_s25 }
  0x5f   : > { %2010 = dma.done.wait (%p2548_p8), %s269_s0, 256  }
  0x60   : > { %2012 = vsyncadd (%p2548_p8), %s269_s0, 4294967040  ;;  %vm326_vm0 = vcmask 123904   ;;  %v2051_v0 = vmov 0.0|0.0   ;;  %vm2052_vm1 = vmmov 0   ;;  %v2053_v1 = vmov 0.0   ;;  %v335_v2 = vld [vmem:[%s272_s5] sm:$0xff] }
  0x61   : > { %1659 = vmatprep.subr.bf16.mxu0 %v2051_v0  ;;  %1607 = vmatprep.mubr.msk.f32.mxu0 %vm2052_vm1, %v2053_v1  ;;  %327 = vst.msk [vmem:[#allocation2] sm:$0x3] %vm326_vm0, %v2053_v1  ;;  %328 = vst.msk [vmem:[#allocation3] sm:$0x3] %vm326_vm0, %v2053_v1  ;;  %v336_v3 = vld [vmem:[%s272_s5 + $0x8] sm:$0xff]  ;;  %vm337_vm2 = vcmask 130048  }
  0x62   : > { %1662 = vmatprep.subr.bf16.mxu1 %v2051_v0  ;;  %1614 = vmatprep.mubr.msk.f32.mxu1 %vm2052_vm1, %v2053_v1  ;;  %v2285_v4 = vpack.c.bf16 %v336_v3, %v335_v2  ;;  %s1525_s27 = smul.u32 14, %s2035_s18  ;;  %s2054_s26 = smov 96  }
  0x63   : > { %s2055_s8 = smov 16   ;;  %s2536_s10 = smov 32  }
  0x64   : > { %1661 = vmatpush3.bf16.msra.mxu0 %v2285_v4  ;;  %1664 = vmatpush3.bf16.msra.mxu1 %v2285_v4  ;;  %s333_s13 = scalar_lea.vmem %s2263_s6, %s1525_s27 [#allocation4]  ;;  %s2057_s11 = smov 80  }
  0x65   : > { %1665 = vmatprep.subr.bf16.mxu0 %v2051_v0  ;;  %1668 = vmatprep.subr.bf16.mxu1 %v2051_v0  ;;  %v334_v6 = vld [vmem:[%s333_s13] sm:$0x3]  ;;  %s2306_s9 = scalar_lea.vmem [#allocation9], %s2259_s25  ;;  %s1528_s12 = smul.u32 10, %s2035_s18 }
  0x66   : > { %s444_s7 = scalar_lea.vmem %s2306_s9, %s1525_s27 [#allocation9]  ;;  %s1534_s22 = smul.u32 6, %s2035_s18 }
  0x67   : > { %s1374_s14 = scalar_lea.vmem %s2263_s6, %s1528_s12 [#allocation4]  ;;  %s1378_s25 = scalar_lea.vmem %s2306_s9, %s1528_s12 [#allocation9] }
  0x68   : > { %v329_v5 = vld [vmem:[#allocation2] sm:$0x3]  ;;  %v330_v11 = vld [vmem:[#allocation3] sm:$0x3]  ;;  %s1382_s0 = scalar_lea.vmem %s2263_s6, %s1534_s22 [#allocation4]  ;;  %s1386_s5 = scalar_lea.vmem %s2306_s9, %s1534_s22 [#allocation9] }
  0x69   : > { %1608 = vmatmul.mubr.msk.f32.vlgmr.msra.gmra.mrb[0].mxu0 %vm337_vm2, %v329_v5  ;;  %v1529_v26 = vld [vmem:[%s1374_s14 + $0x2] sm:$0x3]  ;;  %v1535_v44 = vld [vmem:[%s1382_s0 + $0x4] sm:$0x3]  ;;  %s1540_s27 = sshll.u32 %s2035_s18, 1  ;;  %s776_s12 = ssub.s32 4, %s2035_s18 }
  0x6a   : > { %1667 = vmatpush3.bf16.msra.mxu0 %v2285_v4  ;;  %1621 = vmatprep.mubr.msk.f32.mxu0 %vm2052_vm1, %v2053_v1  ;;  %s1389_s13 = scalar_lea.vmem %s2263_s6, %s1540_s27 [#allocation4]  ;;  %s2356_s14 = sshll.u32 %s776_s12, 1 }
  0x6b   : > { %1671 = vmatprep.subr.bf16.mxu0 %v2051_v0  ;;  %v1541_v62 = vld [vmem:[%s1389_s13 + $0x6] sm:$0x3]  ;;  %s883_s22 = scalar_lea.vmem %s2306_s9, %s2356_s14 [#allocation9]  ;;  %s1549_s0 = smul.u32 4294967290, %s2035_s18 }
  0x6c   : > { %s1555_s13 = smul.u32 4294967286, %s2035_s18  ;;  %p2549_p3 = scmp.ne.s32.totalorder %s2541_s28, 0 }
  0x6d   : > { %s2059_s1 = smov [#allocation10]  }
  0x6e   : > { %s1412_s12 = scalar_lea.vmem %s2306_s9, %s1555_s13 [#allocation9] }
 0x13c   : > { %v407_v7 = vpop.f32.mrb[0].mxu0 }
 0x13d   : > { %v411_v8 = vadd.f32 %v407_v7, %v334_v6  ;;  %v1609_v9 = vpop.f32.mrb[1].mxu0 }
 0x13f   : > { %1773 = vtanh.f32 %v411_v8  ;;  %v1527_v12 = vmul.f32 -1.442695, %v411_v8 }
 0x141   : > { %1775 = vpow2.f32 %v1527_v12 }
 0x149   : > { %v1774_v10 = vpop.eup %1773 }
 0x14a   : > { %425 = vrot.lane.b32.xlu0 %v1774_v10, %s2054_s26 }
 0x14b   : > { %v1776_v13 = vpop.eup %1775 }
 0x14c   : > { %v415_v14 = vadd.f32 1.0, %v1776_v13 }
 0x14e   : > { %420 = vrot.lane.b32.xlu0 %v330_v11, %s2055_s8  ;;  %1777 = vrcp.f32 %v415_v14 }
 0x158   : > { %v1778_v15 = vpop.eup %1777 }
 0x1bc   : > { %v426_v16 = vpop.permute.xlu0 %425 }
 0x1bd   : > { %v428_v17 = vmul.f32 %v1778_v15, %v426_v16 }
 0x1bf   : > { %430 = vrot.lane.b32.xlu1 %v428_v17, %s2055_s8 }
 0x1c0   : > { %v421_v18 = vpop.permute.xlu0 %420 }
 0x1c1   : > { %v423_v19 = vmul.f32 %v1778_v15, %v421_v18 }
 0x231   : > { %v431_v20 = vpop.permute.xlu1 %430 }
 0x232   : > { %v433_v21 = vadd.f32 %v431_v20, %v423_v19 }
 0x234   : > { %1779 = vtanh.f32 %v433_v21 }
 0x23e   : > { %v1780_v22 = vpop.eup %1779 }
 0x23f   : > { %436 = vrot.lane.b32.xlu1 %v1780_v22, %s2536_s10 }
 0x2b1   : > { %v437_v23 = vpop.permute.xlu1 %436 }
 0x2b2   : > { %v439_v24 = vmul.f32 %v1778_v15, %v437_v23 }
 0x2b4   : > { %441 = vrot.lane.b32.xlu0 %v439_v24, %s2057_s11 }
 0x326   : > { %v442_v25 = vpop.permute.xlu0 %441 }
 0x327   : > { %446 = vst.msk [vmem:[%s444_s7] sm:$0x3] %vm326_vm0, %v442_v25  ;;  %1615 = vmatmul.mubr.msk.f32.vlgmr.msra.gmra.mrb[0].mxu1 %vm337_vm2, %v442_v25  ;;  %s1392_s7 = scalar_lea.vmem %s2306_s9, %s1540_s27 [#allocation9]  ;;  %s1404_s27 = scalar_lea.vmem %s2306_s9, %s1549_s0 [#allocation9] }
 0x328   : > { %1670 = vmatpush3.bf16.msra.mxu1 %v2285_v4  ;;  %1628 = vmatprep.mubr.msk.f32.mxu1 %vm2052_vm1, %v2053_v1 }
 0x329   : > { %1674 = vmatprep.subr.bf16.mxu1 %v2051_v0 }
 0x3fa   : > { %v522_v27 = vpop.f32.mrb[0].mxu1 }
 0x3fb   : > { %v526_v28 = vadd.f32 %v1529_v26, %v522_v27  ;;  %v1616_v29 = vpop.f32.mrb[1].mxu1 }
 0x3fd   : > { %1781 = vtanh.f32 %v526_v28  ;;  %v1531_v31 = vmul.f32 -1.442695, %v526_v28 }
 0x3ff   : > { %1783 = vpow2.f32 %v1531_v31 }
 0x407   : > { %v1782_v30 = vpop.eup %1781 }
 0x408   : > { %536 = vrot.lane.b32.xlu1 %v1782_v30, %s2054_s26 }
 0x409   : > { %v1784_v32 = vpop.eup %1783 }
 0x40a   : > { %v530_v33 = vadd.f32 1.0, %v1784_v32 }
 0x40c   : > { %1785 = vrcp.f32 %v530_v33 }
 0x416   : > { %v1786_v34 = vpop.eup %1785 }
 0x417   : > { %v534_v37 = vmul.f32 %v1786_v34, %v433_v21 }
 0x47a   : > { %v537_v35 = vpop.permute.xlu1 %536 }
 0x47b   : > { %v539_v36 = vmul.f32 %v1786_v34, %v537_v35 }
 0x47d   : > { %541 = vrot.lane.b32.xlu0 %v539_v36, %s2055_s8 }
 0x4ef   : > { %v542_v38 = vpop.permute.xlu0 %541 }
 0x4f0   : > { %v544_v39 = vadd.f32 %v542_v38, %v534_v37 }
 0x4f2   : > { %1787 = vtanh.f32 %v544_v39 }
 0x4fc   : > { %v1788_v40 = vpop.eup %1787 }
 0x4fd   : > { %547 = vrot.lane.b32.xlu1 %v1788_v40, %s2536_s10 }
 0x56f   : > { %v548_v41 = vpop.permute.xlu1 %547 }
 0x570   : > { %v550_v42 = vmul.f32 %v1786_v34, %v548_v41 }
 0x572   : > { %552 = vrot.lane.b32.xlu0 %v550_v42, %s2057_s11 }
 0x5e4   : > { %v553_v43 = vpop.permute.xlu0 %552 }
 0x5e5   : > { %1533 = vst.msk [vmem:[%s1378_s25 + $0x2] sm:$0x3] %vm326_vm0, %v553_v43  ;;  %1622 = vmatmul.mubr.msk.f32.vlgmr.msra.gmra.mrb[2].mxu0 %vm337_vm2, %v553_v43  ;;  %s778_s25 = scalar_lea.vmem %s2263_s6, %s2356_s14 [#allocation4]  ;;  %s1561_s14 = smul.u32 4294967282, %s2035_s18 }
 0x5e6   : > { %1673 = vmatpush3.bf16.msra.mxu0 %v2285_v4  ;;  %1635 = vmatprep.mubr.msk.f32.mxu0 %vm2052_vm1, %v2053_v1  ;;  %v779_v18 = vld [vmem:[%s778_s25] sm:$0x3] }
 0x5e7   : > { %1677 = vmatprep.subr.bf16.mxu0 %v2051_v0  ;;  %s1416_s25 = scalar_lea.vmem %s2263_s6, %s1561_s14 [#allocation4] }
 0x6b8   : > { %v632_v45 = vpop.f32.mrb[2].mxu0 }
 0x6b9   : > { %v636_v46 = vadd.f32 %v1535_v44, %v632_v45  ;;  %v1623_v47 = vpop.f32.mrb[3].mxu0 }
 0x6bb   : > { %1789 = vtanh.f32 %v636_v46  ;;  %v1537_v49 = vmul.f32 -1.442695, %v636_v46 }
 0x6bd   : > { %1791 = vpow2.f32 %v1537_v49 }
 0x6c5   : > { %v1790_v48 = vpop.eup %1789 }
 0x6c6   : > { %646 = vrot.lane.b32.xlu1 %v1790_v48, %s2054_s26 }
 0x6c7   : > { %v1792_v50 = vpop.eup %1791 }
 0x6c8   : > { %v640_v51 = vadd.f32 1.0, %v1792_v50 }
 0x6ca   : > { %1793 = vrcp.f32 %v640_v51 }
 0x6d4   : > { %v1794_v52 = vpop.eup %1793 }
 0x6d5   : > { %v644_v55 = vmul.f32 %v1794_v52, %v544_v39 }
 0x738   : > { %v647_v53 = vpop.permute.xlu1 %646 }
 0x739   : > { %v649_v54 = vmul.f32 %v1794_v52, %v647_v53 }
 0x73b   : > { %651 = vrot.lane.b32.xlu0 %v649_v54, %s2055_s8 }
 0x7ad   : > { %v652_v56 = vpop.permute.xlu0 %651 }
 0x7ae   : > { %v654_v57 = vadd.f32 %v652_v56, %v644_v55 }
 0x7b0   : > { %1795 = vtanh.f32 %v654_v57 }
 0x7ba   : > { %v1796_v58 = vpop.eup %1795 }
 0x7bb   : > { %657 = vrot.lane.b32.xlu1 %v1796_v58, %s2536_s10 }
 0x82d   : > { %v658_v59 = vpop.permute.xlu1 %657 }
 0x82e   : > { %v660_v60 = vmul.f32 %v1794_v52, %v658_v59 }
 0x830   : > { %662 = vrot.lane.b32.xlu0 %v660_v60, %s2057_s11 }
 0x8a2   : > { %v663_v61 = vpop.permute.xlu0 %662 }
 0x8a3   : > { %1539 = vst.msk [vmem:[%s1386_s5 + $0x4] sm:$0x3] %vm326_vm0, %v663_v61  ;;  %1629 = vmatmul.mubr.msk.f32.vlgmr.msra.gmra.mrb[2].mxu1 %vm337_vm2, %v663_v61  ;;  %s1400_s5 = scalar_lea.vmem %s2263_s6, %s1549_s0 [#allocation4]  ;;  %s1231_s0 = sand.u32 1, %s2119_s21  }
 0x8a4   : > { %1676 = vmatpush3.bf16.msra.mxu1 %v2285_v4  ;;  %1642 = vmatprep.mubr.msk.f32.mxu1 %vm2052_vm1, %v2053_v1  ;;  %v1550_v36 = vld [vmem:[%s1400_s5 + $0xa] sm:$0x3]  ;;  %s1572_s5 = sshll.u32 %s2035_s18, 5 }
 0x8a5   : > { %1680 = vmatprep.subr.bf16.mxu1 %v2051_v0 }
 0x976   : > { %v741_v63 = vpop.f32.mrb[2].mxu1 }
 0x977   : > { %v745_v2 = vadd.f32 %v1541_v62, %v741_v63  ;;  %v1630_v3 = vpop.f32.mrb[3].mxu1 }
 0x979   : > { %1797 = vtanh.f32 %v745_v2  ;;  %v1543_v6 = vmul.f32 -1.442695, %v745_v2 }
 0x97b   : > { %1799 = vpow2.f32 %v1543_v6 }
 0x983   : > { %v1798_v5 = vpop.eup %1797 }
 0x984   : > { %755 = vrot.lane.b32.xlu1 %v1798_v5, %s2054_s26 }
 0x985   : > { %v1800_v7 = vpop.eup %1799 }
 0x986   : > { %v749_v8 = vadd.f32 1.0, %v1800_v7 }
 0x988   : > { %1801 = vrcp.f32 %v749_v8 }
 0x992   : > { %v1802_v9 = vpop.eup %1801 }
 0x993   : > { %v753_v0 = vmul.f32 %v1802_v9, %v654_v57 }
 0x9f6   : > { %v756_v10 = vpop.permute.xlu1 %755 }
 0x9f7   : > { %v758_v11 = vmul.f32 %v1802_v9, %v756_v10 }
 0x9f9   : > { %760 = vrot.lane.b32.xlu0 %v758_v11, %s2055_s8 }
 0xa6b   : > { %v761_v12 = vpop.permute.xlu0 %760 }
 0xa6c   : > { %v763_v13 = vadd.f32 %v761_v12, %v753_v0 }
 0xa6e   : > { %1803 = vtanh.f32 %v763_v13 }
 0xa78   : > { %v1804_v14 = vpop.eup %1803 }
 0xa79   : > { %766 = vrot.lane.b32.xlu1 %v1804_v14, %s2536_s10 }
 0xaeb   : > { %v767_v15 = vpop.permute.xlu1 %766 }
 0xaec   : > { %v769_v16 = vmul.f32 %v1802_v9, %v767_v15  ;;  %v1562_v9 = vld [vmem:[%s1416_s25 + $0xe] sm:$0x3]  ;;  %s1578_s25 = sshll.u32 %s2035_s18, 8 }
 0xaee   : > { %771 = vrot.lane.b32.xlu0 %v769_v16, %s2057_s11 }
 0xb60   : > { %v772_v17 = vpop.permute.xlu0 %771 }
 0xb61   : > { %1545 = vst.msk [vmem:[%s1392_s7 + $0x6] sm:$0x3] %vm326_vm0, %v772_v17  ;;  %1636 = vmatmul.mubr.msk.f32.vlgmr.msra.gmra.mrb[4].mxu0 %vm337_vm2, %v772_v17  ;;  %s1408_s7 = scalar_lea.vmem %s2263_s6, %s1555_s13 [#allocation4]  ;;  %s2058_s6 = smov 112  }
 0xb62   : > { %1679 = vmatpush3.bf16.msra.mxu0 %v2285_v4  ;;  %1649 = vmatprep.mubr.msk.f32.mxu0 %vm2052_vm1, %v2053_v1  ;;  %v1556_v52 = vld [vmem:[%s1408_s7 + $0xc] sm:$0x3] }
 0xc34   : > { %v850_v19 = vpop.f32.mrb[4].mxu0 }
 0xc35   : > { %v854_v20 = vadd.f32 %v850_v19, %v779_v18  ;;  %v1637_v21 = vpop.f32.mrb[5].mxu0 }
 0xc37   : > { %1805 = vtanh.f32 %v854_v20  ;;  %v1548_v23 = vmul.f32 -1.442695, %v854_v20 }
 0xc39   : > { %1807 = vpow2.f32 %v1548_v23 }
 0xc41   : > { %v1806_v22 = vpop.eup %1805 }
 0xc42   : > { %864 = vrot.lane.b32.xlu1 %v1806_v22, %s2054_s26 }
 0xc43   : > { %v1808_v24 = vpop.eup %1807 }
 0xc44   : > { %v858_v25 = vadd.f32 1.0, %v1808_v24 }
 0xc46   : > { %1809 = vrcp.f32 %v858_v25 }
 0xc50   : > { %v1810_v26 = vpop.eup %1809 }
 0xc51   : > { %v862_v29 = vmul.f32 %v1810_v26, %v763_v13 }
 0xcb4   : > { %v865_v27 = vpop.permute.xlu1 %864 }
 0xcb5   : > { %v867_v28 = vmul.f32 %v1810_v26, %v865_v27 }
 0xcb7   : > { %869 = vrot.lane.b32.xlu0 %v867_v28, %s2055_s8 }
 0xd29   : > { %v870_v30 = vpop.permute.xlu0 %869 }
 0xd2a   : > { %v872_v31 = vadd.f32 %v870_v30, %v862_v29 }
 0xd2c   : > { %1811 = vtanh.f32 %v872_v31 }
 0xd36   : > { %v1812_v32 = vpop.eup %1811 }
 0xd37   : > { %875 = vrot.lane.b32.xlu1 %v1812_v32, %s2536_s10 }
 0xda9   : > { %v876_v33 = vpop.permute.xlu1 %875 }
 0xdaa   : > { %v878_v34 = vmul.f32 %v1810_v26, %v876_v33 }
 0xdac   : > { %880 = vrot.lane.b32.xlu0 %v878_v34, %s2057_s11 }
 0xe1e   : > { %v881_v35 = vpop.permute.xlu0 %880 }
 0xe1f   : > { %884 = vst.msk [vmem:[%s883_s22] sm:$0x3] %vm326_vm0, %v881_v35  ;;  %1643 = vmatmul.mubr.msk.f32.vlgmr.msra.gmra.mrb[4].mxu1 %vm337_vm2, %v881_v35  ;;  %s1256_s22 = sshll.u32 %s2306_s9, 4  ;;  %s2401_s22 = int_to_ptr.vmem [resolvable:$true] %s1256_s22 }
 0xe20   : > { %1682 = vmatpush3.bf16.msra.mxu1 %v2285_v4  ;;  %1656 = vmatprep.mubr.msk.f32.mxu1 %vm2052_vm1, %v2053_v1 }
 0xef2   : > { %v960_v37 = vpop.f32.mrb[4].mxu1 }
 0xef3   : > { %v964_v38 = vadd.f32 %v1550_v36, %v960_v37  ;;  %v1644_v39 = vpop.f32.mrb[5].mxu1 }
 0xef5   : > { %1813 = vtanh.f32 %v964_v38  ;;  %v1552_v41 = vmul.f32 -1.442695, %v964_v38 }
 0xef7   : > { %1815 = vpow2.f32 %v1552_v41 }
 0xeff   : > { %v1814_v40 = vpop.eup %1813 }
 0xf00   : > { %974 = vrot.lane.b32.xlu1 %v1814_v40, %s2054_s26 }
 0xf01   : > { %v1816_v42 = vpop.eup %1815 }
 0xf02   : > { %v968_v43 = vadd.f32 1.0, %v1816_v42 }
 0xf04   : > { %1817 = vrcp.f32 %v968_v43 }
 0xf0e   : > { %v1818_v4 = vpop.eup %1817 }
 0xf0f   : > { %v972_v45 = vmul.f32 %v1818_v4, %v872_v31 }
 0xf72   : > { %v975_v44 = vpop.permute.xlu1 %974 }
 0xf73   : > { %v977_v1 = vmul.f32 %v1818_v4, %v975_v44 }
 0xf75   : > { %979 = vrot.lane.b32.xlu0 %v977_v1, %s2055_s8 }
 0xfe7   : > { %v980_v46 = vpop.permute.xlu0 %979 }
 0xfe8   : > { %v982_v47 = vadd.f32 %v980_v46, %v972_v45 }
 0xfea   : > { %1819 = vtanh.f32 %v982_v47 }
 0xff4   : > { %v1820_v48 = vpop.eup %1819 }
 0xff5   : > { %985 = vrot.lane.b32.xlu1 %v1820_v48, %s2536_s10 }
0x1067   : > { %v986_v49 = vpop.permute.xlu1 %985 }
0x1068   : > { %v988_v50 = vmul.f32 %v1818_v4, %v986_v49 }
0x106a   : > { %990 = vrot.lane.b32.xlu0 %v988_v50, %s2057_s11 }
0x10dc   : > { %v991_v51 = vpop.permute.xlu0 %990 }
0x10dd   : > { %1554 = vst.msk [vmem:[%s1404_s27 + $0xa] sm:$0x3] %vm326_vm0, %v991_v51  ;;  %1650 = vmatmul.mubr.msk.f32.vlgmr.msra.gmra.mrb[6].mxu0 %vm337_vm2, %v991_v51  ;;  %s1420_s27 = scalar_lea.vmem %s2306_s9, %s1561_s14 [#allocation9]  ;;  %s2419_s9 = scalar_lea.hbm %s2530_s2, %s1578_s25 }
0x11b0   : > { %v1070_v53 = vpop.f32.mrb[6].mxu0 }
0x11b1   : > { %v1074_v54 = vadd.f32 %v1556_v52, %v1070_v53  ;;  %v1651_v55 = vpop.f32.mrb[7].mxu0 }
0x11b3   : > { %1821 = vtanh.f32 %v1074_v54  ;;  %v1558_v57 = vmul.f32 -1.442695, %v1074_v54 }
0x11b5   : > { %1823 = vpow2.f32 %v1558_v57 }
0x11bd   : > { %v1822_v56 = vpop.eup %1821 }
0x11be   : > { %1084 = vrot.lane.b32.xlu1 %v1822_v56, %s2054_s26 }
0x11bf   : > { %v1824_v58 = vpop.eup %1823 }
0x11c0   : > { %v1078_v59 = vadd.f32 1.0, %v1824_v58 }
0x11c2   : > { %1825 = vrcp.f32 %v1078_v59 }
0x11cc   : > { %v1826_v60 = vpop.eup %1825 }
0x11cd   : > { %v1082_v63 = vmul.f32 %v1826_v60, %v982_v47 }
0x1230   : > { %v1085_v61 = vpop.permute.xlu1 %1084 }
0x1231   : > { %v1087_v62 = vmul.f32 %v1826_v60, %v1085_v61 }
0x1233   : > { %1089 = vrot.lane.b32.xlu0 %v1087_v62, %s2055_s8 }
0x12a5   : > { %v1090_v2 = vpop.permute.xlu0 %1089 }
0x12a6   : > { %v1092_v3 = vadd.f32 %v1090_v2, %v1082_v63 }
0x12a8   : > { %1827 = vtanh.f32 %v1092_v3 }
0x12b2   : > { %v1828_v5 = vpop.eup %1827 }
0x12b3   : > { %1095 = vrot.lane.b32.xlu1 %v1828_v5, %s2536_s10 }
0x1325   : > { %v1096_v6 = vpop.permute.xlu1 %1095 }
0x1326   : > { %v1098_v7 = vmul.f32 %v1826_v60, %v1096_v6 }
0x1328   : > { %1100 = vrot.lane.b32.xlu0 %v1098_v7, %s2057_s11 }
0x139a   : > { %v1101_v8 = vpop.permute.xlu0 %1100 }
0x139b   : > { %1560 = vst.msk [vmem:[%s1412_s12 + $0xc] sm:$0x3] %vm326_vm0, %v1101_v8  ;;  %1657 = vmatmul.mubr.msk.f32.vlgmr.msra.gmra.mrb[6].mxu1 %vm337_vm2, %v1101_v8 }
0x146e   : > { %v1180_v10 = vpop.f32.mrb[6].mxu1 }
0x146f   : > { %v1184_v11 = vadd.f32 %v1562_v9, %v1180_v10  ;;  %v1658_v0 = vpop.f32.mrb[7].mxu1 }
0x1471   : > { %1829 = vtanh.f32 %v1184_v11  ;;  %v1564_v13 = vmul.f32 -1.442695, %v1184_v11 }
0x1473   : > { %1831 = vpow2.f32 %v1564_v13 }
0x147b   : > { %v1830_v12 = vpop.eup %1829 }
0x147c   : > { %1194 = vrot.lane.b32.xlu1 %v1830_v12, %s2054_s26  ;;  %s1523_s26 = sshll.u32 %s2256_s24, 1 }
0x147d   : > { %v1832_v14 = vpop.eup %1831  ;;  %s304_s13 = scalar_lea.vmem [#allocation10], %s1523_s26 }
0x147e   : > { %v1188_v15 = vadd.f32 1.0, %v1832_v14  ;;  %s1272_s7 = sshll.u32 %s304_s13, 4  ;;  %s2414_s7 = int_to_ptr.vmem [resolvable:$true] %s1272_s7 }
0x1480   : > { %1833 = vrcp.f32 %v1188_v15 }
0x148a   : > { %v1834_v16 = vpop.eup %1833 }
0x148b   : > { %v1192_v19 = vmul.f32 %v1834_v16, %v1092_v3 }
0x14ee   : > { %v1195_v17 = vpop.permute.xlu1 %1194 }
0x14ef   : > { %v1197_v18 = vmul.f32 %v1834_v16, %v1195_v17 }
0x14f1   : > { %1199 = vrot.lane.b32.xlu0 %v1197_v18, %s2055_s8  ;;  %s311_s8 = scalar_lea.vmem [#allocation12], %s1523_s26  ;;  %s2427_s26 = scalar_lea.hbm %s2532_s4, %s1572_s5 }
0x14f2   : > { %s1285_s12 = sshll.u32 %s311_s8, 4  ;;  %s2429_s12 = int_to_ptr.vmem [resolvable:$true] %s1285_s12 }
0x1563   : > { %v1200_v20 = vpop.permute.xlu0 %1199 }
0x1564   : > { %v1202_v21 = vadd.f32 %v1200_v20, %v1192_v19 }
0x1566   : > { %1835 = vtanh.f32 %v1202_v21 }
0x1570   : > { %v1836_v22 = vpop.eup %1835 }
0x1571   : > { %1205 = vrot.lane.b32.xlu1 %v1836_v22, %s2536_s10  ;;  %s2412_s10 = scalar_lea.hbm %s2531_s3, %s1572_s5 }
0x1575   : > { %1217 = vrot.lane.b32.xlu1 %v1202_v21, %s2058_s6  ;;  %s1897_s6 = scalar_lea.vmem %s2414_s7, 32 }
0x1576   : > { %p1898_p0 = scmp.ne.s32.totalorder %s2414_s7, %s1897_s6 }
0x1578   : > { %p1899_p11 = pnand %p1898_p0, %p2549_p3 }
0x157a   : > { %p1900_p13 = pneg %p1899_p11 }
0x15e3   : > { %v1206_v23 = vpop.permute.xlu1 %1205 }
0x15e4   : > { %v1208_v24 = vmul.f32 %v1834_v16, %v1206_v23 }
0x15e6   : > { %1210 = vrot.lane.b32.xlu0 %v1208_v24, %s2057_s11 }
0x15e7   : > { %v1218_v25 = vpop.permute.xlu1 %1217 }
0x15e8   : > { %1220 = vst.msk [vmem:[#allocation3] sm:$0x3] %vm326_vm0, %v1218_v25  ;;  %1225 = vst.msk [vmem:[%s311_s8] sm:$0x3] %vm326_vm0, %v1218_v25  ;;  %s2431_s8 = scalar_lea.sflag [#allocation11], %s1231_s0 }
0x1658   : > { %v1211_v26 = vpop.permute.xlu0 %1210 }
0x1659   : > { %1566 = vst.msk [vmem:[%s1420_s27 + $0xe] sm:$0x3] %vm326_vm0, %v1211_v26  ;;  %1215 = vst.msk [vmem:[#allocation2] sm:$0x3] %vm326_vm0, %v1211_v26  ;;  %s1901_s27 = sshll.u32 %s2059_s1, 4  ;;  %s1902_s27 = int_to_ptr.vmem [resolvable:$false] %s1901_s27 }
0x165a   : > { %1224 = vst.msk [vmem:[%s304_s13] sm:$0x3] %vm326_vm0, %v1211_v26  ;;  %s1903_s25 = scalar_lea.vmem %s1902_s27, 64  ;;  %p1904_p7 = scmp.lt.s32.totalorder %s2414_s7, %s1902_s27 }
0x165b   : > { %p1905_p10 = scmp.lt.s32.totalorder %s1903_s25, %s1897_s6 }
0x165d   : > { %p1906_p12 = por %p1905_p10, %p1904_p7 }
0x165f   : > { %p1907_p9 = pnand %p1906_p12, %p1900_p13 }
0x1661   : > { %1910 = shalt.err (!%p1907_p9)
}
0x1662   : > { %s1911_s0 = scalar_lea.hbm %s2412_s10, 32  ;;  %s1915_s11 = scalar_lea.hbm %s2531_s3, 64 }
0x1663   : > { %p1912_p1 = scmp.ne.s32.totalorder %s2412_s10, %s1911_s0  ;;  %p1916_p5 = scmp.lt.u32.totalorder %s2412_s10, %s2531_s3 }
0x1664   : > { %p1917_p4 = scmp.lt.u32.totalorder %s1915_s11, %s1911_s0  ;;  %p1919_p0 = scmp.lt.u32.totalorder %s1911_s0, %s2412_s10 }
0x1665   : > { %p1913_p6 = pnand %p1912_p1, %p2549_p3 }
0x1666   : > { %p1918_p8 = por %p1917_p4, %p1916_p5 }
0x1667   : > { %p1914_p2 = pneg %p1913_p6 }
0x1668   : > { %p1920_p11 = por %p1919_p0, %p1918_p8 }
0x166a   : > { %p1921_p13 = pnand %p1920_p11, %p1914_p2 }
0x166c   : > { %1924 = shalt.err (!%p1921_p13)
}
0x166d   : > { %1688 = dma.vmem_to_hbm [thread:$0]  (%p2549_p3), %s2414_s7, 32, %s2412_s10, %s2431_s8  }
0x166e   : > { %s1227_s14 = scalar_lea.sflag [#allocation6], %s2256_s24  ;;  %s1925_s6 = scalar_lea.vmem %s2401_s22, 256 }
0x166f   : > { %p1926_p7 = scmp.ne.s32.totalorder %s2401_s22, %s1925_s6  ;;  %s2060_s1 = smov [#allocation9]  }
0x1670   : > { %s1929_s27 = sshll.u32 %s2060_s1, 4  ;;  %s1930_s27 = int_to_ptr.vmem [resolvable:$false] %s1929_s27 }
0x1671   : > { %p1927_p10 = pnand %p1926_p7, %p2549_p3  ;;  %s1931_s25 = scalar_lea.vmem %s1930_s27, 512 }
0x1672   : > { %p1932_p9 = scmp.lt.s32.totalorder %s2401_s22, %s1930_s27  ;;  %p1933_p1 = scmp.lt.s32.totalorder %s1931_s25, %s1925_s6 }
0x1673   : > { %p1928_p12 = pneg %p1927_p10 }
0x1674   : > { %p1934_p6 = por %p1933_p1, %p1932_p9 }
0x1676   : > { %p1935_p2 = pnand %p1934_p6, %p1928_p12 }
0x1678   : > { %1938 = shalt.err (!%p1935_p2)
}
0x1679   : > { %s1939_s10 = scalar_lea.hbm %s2419_s9, 256  ;;  %s1943_s5 = scalar_lea.hbm %s2530_s2, 512 }
0x167a   : > { %p1940_p5 = scmp.ne.s32.totalorder %s2419_s9, %s1939_s10  ;;  %p1944_p0 = scmp.lt.u32.totalorder %s2419_s9, %s2530_s2 }
0x167b   : > { %p1945_p11 = scmp.lt.u32.totalorder %s1943_s5, %s1939_s10  ;;  %p1947_p7 = scmp.lt.u32.totalorder %s1939_s10, %s2419_s9 }
0x167c   : > { %p1941_p4 = pnand %p1940_p5, %p2549_p3 }
0x167d   : > { %p1946_p13 = por %p1945_p11, %p1944_p0 }
0x167e   : > { %p1942_p8 = pneg %p1941_p4 }
0x167f   : > { %p1948_p10 = por %p1947_p7, %p1946_p13 }
0x1681   : > { %p1949_p12 = pnand %p1948_p10, %p1942_p8 }
0x1683   : > { %1952 = shalt.err (!%p1949_p12)
}
0x1684   : > { %s2061_s21 = smov 2   ;;  %s2550_s18 = smov 32  }
0x1685   : > { %1687 = dma.vmem_to_hbm [thread:$0]  (%p2549_p3), %s2401_s22, 256, %s2419_s9, %s1227_s14, %s2550_s18, %s2550_s18, %s2061_s21  }
0x1686   : > { %s1953_s6 = scalar_lea.vmem %s2429_s12, 32  ;;  %s2062_s1 = smov [#allocation12]  }
0x1687   : > { %p1954_p9 = scmp.ne.s32.totalorder %s2429_s12, %s1953_s6  ;;  %s1957_s27 = sshll.u32 %s2062_s1, 4  ;;  %s1958_s27 = int_to_ptr.vmem [resolvable:$false] %s1957_s27 }
0x1688   : > { %s1959_s25 = scalar_lea.vmem %s1958_s27, 64  ;;  %p1960_p2 = scmp.lt.s32.totalorder %s2429_s12, %s1958_s27 }
0x1689   : > { %p1955_p1 = pnand %p1954_p9, %p2549_p3  ;;  %p1961_p5 = scmp.lt.s32.totalorder %s1959_s25, %s1953_s6 }
0x168b   : > { %p1956_p6 = pneg %p1955_p1  ;;  %p1962_p4 = por %p1961_p5, %p1960_p2 }
0x168d   : > { %p1963_p8 = pnand %p1962_p4, %p1956_p6 }
0x168f   : > { %1966 = shalt.err (!%p1963_p8)
}
0x1690   : > { %s1967_s24 = scalar_lea.hbm %s2427_s26, 32  ;;  %s1971_s14 = scalar_lea.hbm %s2532_s4, 64 }
0x1691   : > { %p1968_p0 = scmp.ne.s32.totalorder %s2427_s26, %s1967_s24  ;;  %p1972_p7 = scmp.lt.u32.totalorder %s2427_s26, %s2532_s4 }
0x1692   : > { %p1973_p10 = scmp.lt.u32.totalorder %s1971_s14, %s1967_s24  ;;  %p1975_p9 = scmp.lt.u32.totalorder %s1967_s24, %s2427_s26 }
0x1693   : > { %p1969_p11 = pnand %p1968_p0, %p2549_p3 }
0x1694   : > { %p1974_p12 = por %p1973_p10, %p1972_p7 }
0x1695   : > { %p1970_p13 = pneg %p1969_p11 }
0x1696   : > { %p1976_p1 = por %p1975_p9, %p1974_p12 }
0x1698   : > { %p1977_p6 = pnand %p1976_p1, %p1970_p13 }
0x169a   : > { %1980 = shalt.err (!%p1977_p6)
}
0x169b   : > { %1689 = dma.vmem_to_hbm [thread:$0]  (%p2549_p3), %s2429_s12, 32, %s2427_s26, %s2431_s8  }
0x169c PF: > { %s1297_s0 = sand.u32 1, %s2023_s15   ;;  %p2551_p2 = scmp.ne.s32.totalorder %s2542_s30, 0 }
0x169d   : > { %p2552_p5 = scmp.ge.s32.totalorder %s2043_s20, 2  ;;  %s1298_s5 = scalar_lea.sflag [#allocation6], %s1297_s0 }
0x169f   : > { %p1701_p4 = pnand %p2552_p5, %p2551_p2 }
0x16a1   : > { %2014 = dma.done.wait (!%p1701_p4), %s1298_s5, 256  }
0x16a2   : > { %2016 = vsyncadd (!%p1701_p4), %s1298_s5, 4294967040  ;;  %s2553_s13 = sadd.s32 4294967294, %s2043_s20  }
0x16a3   : > { %s1306_s11 = sand.u32 1, %s2553_s13  }
0x16a4   : > { %s1307_s21 = scalar_lea.sflag [#allocation11], %s1306_s11 }
0x16a5   : > { %2018 = dma.done.wait (!%p1701_p4), %s1307_s21, 64  }
0x16a6   : > { %2020 = vsyncadd (!%p1701_p4), %s1307_s21, 4294967232  ;;  %s27_s20 = sadd.s32 1, %s2043_s20   ;;  %s2554_s15 = smov %s2027_s16 }
0x16a7   : > { %p24_p3 = scmp.ge.s32.totalorder %s27_s20, 4   ;;  %s2555_s16 = smov %s2031_s17 }
0x16a8   : > { %s2556_s17 = smov %s2150_s29  ;;  %s2557_s18 = smov %s2039_s19 }
0x16a9   : > { %s2558_s19 = smov %s2560_s23  ;;  %26 = sbr.rel (!%p24_p3) target bundleno = 13 (0xd), region = 142 }
0x16b0   :  { %1321 = vsyncpa [#allocation5], 1 }
0x16b1   :  { %1323 = vsyncpa [#allocation5 + $0x1], 1 }
0x16b2   :  { %1324 = vsyncpa [#allocation8], 1 }
0x16b3   :  { %1326 = vsyncpa [#allocation8 + $0x1], 1 }
0x16b4   :  { %1327 = vsyncpa [#allocation6], 1 }
0x16b5   :  { %1329 = vsyncpa [#allocation6 + $0x1], 1 }
0x16b6   :  { %1330 = vsyncpa [#allocation11], 1 }
0x16b7   :  { %1332 = vsyncpa [#allocation11 + $0x1], 1 }

</bundles_post_ra>
